<compile_context>
chip_gen: v6e
topology: v6e:2x2x1
jax: 0.10.0
libtpu: 0.0.40
codegen_flags: <defaults>
</compile_context>

<pallas_src>
import functools

import jax
import jax.numpy as jnp
from jax import lax
from jax.experimental import pallas as pl
from jax.experimental.pallas import tpu as pltpu

EPS = 1e-5


def _round_up(x, m):
    return ((x + m - 1) // m) * m


def _layernorm(x, g, b):
    # f32 math (v5e has no bf16 VPU/EUP)
    mu = jnp.mean(x, axis=-1, keepdims=True)
    var = jnp.mean((x - mu) ** 2, axis=-1, keepdims=True)
    return (x - mu) * lax.rsqrt(var + EPS) * g + b


def _vmem_limit_bytes():
    # generation-aware: ~109 MiB on v5e/v6e (128 MiB physical), ~54 MiB on v7x (64 MiB)
    try:
        cap = pltpu.get_tpu_info().vmem_capacity_bytes
    except Exception:
        cap = 64 * 1024 * 1024
    return int(cap * 0.85)


def _bf16_elementwise_ok():
    # v6e / v7x have bf16 VPU/EUP; keep the QuickGELU gate in f32 elsewhere (v5e etc.)
    try:
        kind = jax.devices()[0].device_kind.lower()
    except Exception:
        return False
    return ("v6" in kind) or ("v7" in kind) or ("7x" in kind)


def _pick_batch_tile(B, Sp, D, DM, H, vmem_limit):
    """Largest power-of-two batch tile (<=8) whose live f32 intermediates fit next to the
    double-buffered bf16 layer weights inside the VMEM limit."""
    w_bytes = 2 * 2 * (D * 3 * D + D * D + 2 * D * DM)          # 2 buffers x bf16 weights
    per_img = 2 * 4 * (3 * Sp * D + 4 * Sp * D + H * Sp * Sp + Sp * DM)   # f32 + headroom
    budget = max(vmem_limit - w_bytes, per_img)
    bt = 1
    while bt * 2 <= min(B, 8) and (bt * 2) * per_img <= budget:
        bt *= 2
    return bt


# ---------------------------------------------------------------------------
# Pallas kernels
# ---------------------------------------------------------------------------

def patch_embed_kernel(p_ref, w_ref, o_ref):
    # (TM, C*p*p)bf16 @ (C*p*p, D)bf16 -> f32 ; CLIP conv1 has no bias
    o_ref[...] = jnp.dot(p_ref[...], w_ref[...], preferred_element_type=jnp.float32)


def vit_stack_kernel(x_ref, pos_ref, lnpre_g, lnpre_b,
                     ln1g, ln1b, wqkv, bqkv, wo, bo,
                     ln2g, ln2b, w1, b1, w2, b2,
                     o_ref, x_sc, *, num_heads, seq_len, gelu_bf16):
    """One grid step = (batch tile of Bt images, one layer).

    grid = (B//Bt, L); the batch axis is "parallel", l is "arbitrary" (and must stay last).
    The residual stream for the current batch tile is carried across the l axis in the
    VMEM scratch x_sc (f32).  Per-layer weights arrive in bf16 via l-indexed BlockSpecs,
    so layer l+1's weights are prefetched while layer l computes, and each weight fetch is
    amortised over Bt images.  The output is written only at l == L-1.
    """
    l = pl.program_id(1)
    n_l = pl.num_programs(1)

    # --- init at first layer: add positional embedding, ln_pre ---
    @pl.when(l == 0)
    def _():
        x0 = x_ref[...] + pos_ref[...]                       # (Bt, Sp, D) f32
        x_sc[...] = _layernorm(x0, lnpre_g[...], lnpre_b[...])

    x = x_sc[...]                                            # (Bt, Sp, D) f32
    Bt, Sp, D = x.shape
    dh = D // num_heads
    bf16 = jnp.bfloat16
    f32 = jnp.float32

    # --- attention branch ---
    xn = _layernorm(x, ln1g[0], ln1b[0]).reshape(Bt * Sp, D).astype(bf16)
    qkv = jnp.dot(xn, wqkv[0], preferred_element_type=f32) + bqkv[0]     # (Bt*Sp, 3D) f32
    # 1/sqrt(dh) is pre-folded into wqkv's / bqkv's Q columns at init time.

    def split_heads(t):
        # (Bt*Sp, D) -> (H*Bt, Sp, dh): merged leading batch axis g = h*Bt + b
        t = t.reshape(Bt * Sp, num_heads, dh).transpose(1, 0, 2)   # (H, Bt*Sp, dh)
        return t.reshape(num_heads * Bt, Sp, dh)

    q = split_heads(qkv[:, :D])
    k = split_heads(qkv[:, D:2 * D])
    v = split_heads(qkv[:, 2 * D:])

    s = jnp.einsum('gqd,gkd->gqk', q.astype(bf16), k.astype(bf16),
                   preferred_element_type=f32)                       # (H*Bt, Sp, Sp) f32
    if seq_len != Sp:
        # mask padded key columns to -inf before softmax (f32 scores -> -1e30 is safe)
        key_idx = lax.broadcasted_iota(jnp.int32, (1, 1, Sp), 2)
        s = jnp.where(key_idx < seq_len, s, -1e30)
    s = s - jnp.max(s, axis=-1, keepdims=True)
    p = jnp.exp(s)
    p = p * pl.reciprocal(jnp.sum(p, axis=-1, keepdims=True), approx=True)
    attn = jnp.einsum('gqk,gkd->gqd', p.astype(bf16), v.astype(bf16),
                      preferred_element_type=f32)                    # (H*Bt, Sp, dh) f32
    attn = attn.reshape(num_heads, Bt * Sp, dh).transpose(1, 0, 2).reshape(Bt * Sp, D)
    out = jnp.dot(attn.astype(bf16), wo[0], preferred_element_type=f32) + bo[0]
    x = x + out.reshape(Bt, Sp, D)

    # --- MLP branch (QuickGELU) ---
    # Note: for ViT-L-class configs on v7x (64 MiB VMEM), w1/w2 should additionally be
    # split along DM with an inner grid axis / emit_pipeline; not needed at ViT-B scale.
    xn2 = _layernorm(x, ln2g[0], ln2b[0]).reshape(Bt * Sp, D).astype(bf16)
    h1 = jnp.dot(xn2, w1[0], preferred_element_type=f32) + b1[0]     # (Bt*Sp, DM) f32
    if gelu_bf16:
        g = h1.astype(bf16)
        h1 = g * jax.nn.sigmoid(1.702 * g)                           # bf16 VPU/EUP
    else:
        h1 = (h1 * jax.nn.sigmoid(1.702 * h1)).astype(bf16)          # f32 math (v5e)
    h2 = jnp.dot(h1, w2[0], preferred_element_type=f32) + b2[0]
    x = x + h2.reshape(Bt, Sp, D)

    x_sc[...] = x

    @pl.when(l == n_l - 1)
    def _():
        o_ref[...] = x


# ---------------------------------------------------------------------------
# Wrapper
# ---------------------------------------------------------------------------

def encode_image(images, params, *, patch, num_heads):
    B, C, H, W = images.shape
    D = params['conv_w_flat'].shape[1]
    gh, gw = H // patch, W // patch
    n_p = gh * gw
    S = n_p + 1
    Sp = _round_up(S, 16)               # 16-row aligned (bf16 packs 2 rows / sublane)

    vmem_limit = _vmem_limit_bytes()
    gelu_bf16 = _bf16_elementwise_ok()

    # --- patch extraction (glue): conv1 with stride == kernel == patch is a matmul ---
    patches = images.reshape(B, C, gh, patch, gw, patch)
    patches = patches.transpose(0, 2, 4, 1, 3, 5).reshape(B * n_p, C * patch * patch)
    patches = patches.astype(jnp.bfloat16)
    w_flat = params['conv_w_flat']      # (C*p*p, D) bf16, pre-flattened at init time

    rows = B * n_p
    K = C * patch * patch
    TM = min(512, _round_up(rows, 8))   # bigger row tile -> fewer grid steps, ~85% HBM BW
    emb = pl.pallas_call(
        patch_embed_kernel,
        grid=(pl.cdiv(rows, TM),),
        in_specs=[pl.BlockSpec((TM, K), lambda i: (i, 0)),
                  pl.BlockSpec((K, D), lambda i: (0, 0))],
        out_specs=pl.BlockSpec((TM, D), lambda i: (i, 0)),
        out_shape=jax.ShapeDtypeStruct((rows, D), jnp.float32),
        compiler_params=pltpu.CompilerParams(
            dimension_semantics=("parallel",),
            vmem_limit_bytes=vmem_limit),
    )(patches, w_flat)
    emb = emb.reshape(B, n_p, D)

    # --- class token concat + pad sequence to Sp (glue) ---
    cls = jnp.broadcast_to(params['cls'][None, None, :], (B, 1, D))
    x = jnp.concatenate([cls, emb], axis=1)                  # (B, S, D) f32
    pos = params['pos']
    if Sp > S:
        x = jnp.pad(x, ((0, 0), (0, Sp - S), (0, 0)))
        pos = jnp.pad(pos, ((0, Sp - S), (0, 0)))

    L = params['wqkv'].shape[0]
    DM = params['w1'].shape[-1]

    # --- batch tile: Bt images share each resident layer-weight set ---
    Bt = _pick_batch_tile(B, Sp, D, DM, num_heads, vmem_limit)
    B_pad = _round_up(B, Bt)
    if B_pad > B:
        x = jnp.pad(x, ((0, B_pad - B), (0, 0), (0, 0)))     # padded images are dropped

    xmap = lambda b, l: (b, 0, 0)       # per-batch-tile block, resident across layers
    cmap = lambda b, l: (0, 0)          # constants (pos / ln_pre)
    wmap = lambda b, l: (l, 0, 0)       # per-layer weights -> prefetched along l

    x = pl.pallas_call(
        functools.partial(vit_stack_kernel, num_heads=num_heads,
                          seq_len=S, gelu_bf16=gelu_bf16),
        grid=(B_pad // Bt, L),
        in_specs=[
            pl.BlockSpec((Bt, Sp, D), xmap),       # x (ln_pre input)
            pl.BlockSpec((Sp, D), cmap),           # positional embedding
            pl.BlockSpec((1, D), cmap),            # ln_pre gamma
            pl.BlockSpec((1, D), cmap),            # ln_pre beta
            pl.BlockSpec((1, 1, D), wmap),         # ln1 gamma
            pl.BlockSpec((1, 1, D), wmap),         # ln1 beta
            pl.BlockSpec((1, D, 3 * D), wmap),     # wqkv (bf16, Q columns pre-scaled)
            pl.BlockSpec((1, 1, 3 * D), wmap),     # bqkv
            pl.BlockSpec((1, D, D), wmap),         # wo (bf16)
            pl.BlockSpec((1, 1, D), wmap),         # bo
            pl.BlockSpec((1, 1, D), wmap),         # ln2 gamma
            pl.BlockSpec((1, 1, D), wmap),         # ln2 beta
            pl.BlockSpec((1, D, DM), wmap),        # w1 (bf16)
            pl.BlockSpec((1, 1, DM), wmap),        # b1
            pl.BlockSpec((1, DM, D), wmap),        # w2 (bf16)
            pl.BlockSpec((1, 1, D), wmap),         # b2
        ],
        out_specs=pl.BlockSpec((Bt, Sp, D), xmap),
        out_shape=jax.ShapeDtypeStruct((B_pad, Sp, D), jnp.float32),
        scratch_shapes=[pltpu.VMEM((Bt, Sp, D), jnp.float32)],   # residual stream carry
        input_output_aliases={0: 0},               # reuse the x HBM buffer for the output
        compiler_params=pltpu.CompilerParams(
            dimension_semantics=("parallel", "arbitrary"),
            vmem_limit_bytes=vmem_limit),
    )(x, pos, params['ln_pre_g'], params['ln_pre_b'],
      params['ln1_g'], params['ln1_b'], params['wqkv'], params['bqkv'],
      params['wo'], params['bo'], params['ln2_g'], params['ln2_b'],
      params['w1'], params['b1'], params['w2'], params['b2'])

    # --- head: ln_post(CLS) @ proj.  Tiny (B, D) work; plain XLA per perf review. ---
    cls_out = x[:B, 0, :]
    xn = _layernorm(cls_out, params['ln_post_g'], params['ln_post_b'])
    return jnp.dot(xn, params['proj'])


# ---------------------------------------------------------------------------
# Deterministic synthetic parameters (pretrained=False -> random init)
# ---------------------------------------------------------------------------

def init_params(key, *, C, patch, D, heads, layers, mlp_ratio, out_dim, S):
    DM = mlp_ratio * D
    dh = D // heads
    ks = jax.random.split(key, 8)
    std = 0.02
    f32, bf16 = jnp.float32, jnp.bfloat16

    # conv1 weight pre-flattened / transposed / cast once (one-time host transform)
    conv_w = jax.random.normal(ks[0], (D, C, patch, patch), f32) * std
    conv_w_flat = conv_w.reshape(D, C * patch * patch).T.astype(bf16)

    # fold 1/sqrt(dh) into the Q columns of wqkv / bqkv (in f32, before the bf16 cast)
    wqkv = jax.random.normal(ks[4], (layers, D, 3 * D), f32) * std
    bqkv = jnp.zeros((layers, 1, 3 * D), f32)
    q_scale = jnp.concatenate([jnp.full((D,), dh ** -0.5, f32),
                               jnp.ones((2 * D,), f32)])
    wqkv = wqkv * q_scale
    bqkv = bqkv * q_scale

    params = {
        'conv_w_flat': conv_w_flat,
        'cls': jax.random.normal(ks[1], (D,), f32) * std,
        'pos': jax.random.normal(ks[2], (S, D), f32) * std,
        'ln_pre_g': jnp.ones((1, D), f32), 'ln_pre_b': jnp.zeros((1, D), f32),
        'ln_post_g': jnp.ones((D,), f32), 'ln_post_b': jnp.zeros((D,), f32),
        'proj': jax.random.normal(ks[3], (D, out_dim), f32) * std,
        # per-layer weights stacked on a leading layer axis; matmul weights in bf16
        'ln1_g': jnp.ones((layers, 1, D), f32), 'ln1_b': jnp.zeros((layers, 1, D), f32),
        'wqkv': wqkv.astype(bf16),
        'bqkv': bqkv,
        'wo': (jax.random.normal(ks[5], (layers, D, D), f32) * std).astype(bf16),
        'bo': jnp.zeros((layers, 1, D), f32),
        'ln2_g': jnp.ones((layers, 1, D), f32), 'ln2_b': jnp.zeros((layers, 1, D), f32),
        'w1': (jax.random.normal(ks[6], (layers, D, DM), f32) * std).astype(bf16),
        'b1': jnp.zeros((layers, 1, DM), f32),
        'w2': (jax.random.normal(ks[7], (layers, DM, D), f32) * std).astype(bf16),
        'b2': jnp.zeros((layers, 1, D), f32),
    }
    return params


if __name__ == "__main__":
    # small CLIP-ViT-ish config: 16x16 images, patch 8 -> 4 patches + CLS, width 32
    B, C, H, W = 2, 3, 16, 16
    PATCH, D, HEADS, LAYERS, MLP_RATIO, OUT_DIM = 8, 32, 4, 2, 4, 16
    S = (H // PATCH) * (W // PATCH) + 1

    key = jax.random.PRNGKey(0)
    k_img, k_par = jax.random.split(key)
    images = jax.random.normal(k_img, (B, C, H, W), jnp.float32)
    params = init_params(k_par, C=C, patch=PATCH, D=D, heads=HEADS, layers=LAYERS,
                         mlp_ratio=MLP_RATIO, out_dim=OUT_DIM, S=S)

    # TODO(synk): clip.load preprocessing / save-load (torch I/O) have no Pallas equivalent.
    encode = jax.jit(functools.partial(encode_image, patch=PATCH, num_heads=HEADS))
    feats = jax.block_until_ready(encode(images, params))
    assert feats.shape == (B, OUT_DIM) and feats.dtype == jnp.float32
    print("KERNEL_OK")
</pallas_src>

<mosaic_0001>
module attributes {stable_mosaic.version = 11 : i64} {
  func.func @patch_embed_kernel(%arg0: i32, %arg1: memref<8x192xbf16, #tpu.memory_space<vmem>>, %arg2: memref<192x32xbf16, #tpu.memory_space<vmem>>, %arg3: memref<8x32xf32, #tpu.memory_space<vmem>>) attributes {dimension_semantics = [#tpu.dimension_semantics<parallel>], iteration_bounds = array<i64: 1>, scalar_prefetch = 0 : i64, scratch_operands = 0 : i64, tpu.core_type = #tpu.core_type<tc>, window_params = [{transform_indices = @transform_0, window_bounds = array<i64: 8, 192>}, {pipeline_mode = #tpu.pipeline_mode<synchronous>, transform_indices = @transform_1, window_bounds = array<i64: 192, 32>}, {transform_indices = @transform_2, window_bounds = array<i64: 8, 32>}]} {
    %c0 = arith.constant 0 : index
    %c0_0 = arith.constant 0 : index
    %0 = vector.load %arg1[%c0, %c0_0] : memref<8x192xbf16, #tpu.memory_space<vmem>>, vector<8x192xbf16>
    %c0_1 = arith.constant 0 : index
    %c0_2 = arith.constant 0 : index
    %1 = vector.load %arg2[%c0_1, %c0_2] : memref<192x32xbf16, #tpu.memory_space<vmem>>, vector<192x32xbf16>
    %cst = arith.constant dense<0.000000e+00> : vector<8x32xf32>
    %2 = tpu.matmul %0, %1, %cst {dimension_numbers = #tpu.dot_dimension_numbers<[1], [0], [0], [1], [0, 0, 1, 1], [], []>} : vector<8x192xbf16>, vector<192x32xbf16>, vector<8x32xf32> -> vector<8x32xf32>
    %c0_3 = arith.constant 0 : index
    %c0_4 = arith.constant 0 : index
    %3 = vector.load %arg3[%c0_3, %c0_4] : memref<8x32xf32, #tpu.memory_space<vmem>>, vector<8x32xf32>
    tpu.vector_store %arg3[%c0_3, %c0_4], %2 {strides = array<i32>} : memref<8x32xf32, #tpu.memory_space<vmem>>, vector<8x32xf32>,
    return
  }
  func.func @transform_0(%arg0: i32) -> (i32, i32) {
    %c0_i32 = arith.constant 0 : i32
    %c0_i32_0 = arith.constant 0 : i32
    return %arg0, %c0_i32 : i32, i32
  }
  func.func @transform_1(%arg0: i32) -> (i32, i32) {
    %c0_i32 = arith.constant 0 : i32
    %c0_i32_0 = arith.constant 0 : i32
    %c0_i32_1 = arith.constant 0 : i32
    return %c0_i32, %c0_i32_0 : i32, i32
  }
  func.func @transform_2(%arg0: i32) -> (i32, i32) {
    %c0_i32 = arith.constant 0 : i32
    %c0_i32_0 = arith.constant 0 : i32
    return %arg0, %c0_i32 : i32, i32
  }
}

module attributes {stable_mosaic.version = 11 : i64} {
  func.func @vit_stack_kernel(%arg0: i32, %arg1: i32, %arg2: memref<2x16x32xf32, #tpu.memory_space<vmem>>, %arg3: memref<16x32xf32, #tpu.memory_space<vmem>>, %arg4: memref<1x32xf32, #tpu.memory_space<vmem>>, %arg5: memref<1x32xf32, #tpu.memory_space<vmem>>, %arg6: memref<1x1x32xf32, #tpu.memory_space<vmem>>, %arg7: memref<1x1x32xf32, #tpu.memory_space<vmem>>, %arg8: memref<1x32x96xbf16, #tpu.memory_space<vmem>>, %arg9: memref<1x1x96xf32, #tpu.memory_space<vmem>>, %arg10: memref<1x32x32xbf16, #tpu.memory_space<vmem>>, %arg11: memref<1x1x32xf32, #tpu.memory_space<vmem>>, %arg12: memref<1x1x32xf32, #tpu.memory_space<vmem>>, %arg13: memref<1x1x32xf32, #tpu.memory_space<vmem>>, %arg14: memref<1x32x128xbf16, #tpu.memory_space<vmem>>, %arg15: memref<1x1x128xf32, #tpu.memory_space<vmem>>, %arg16: memref<1x128x32xbf16, #tpu.memory_space<vmem>>, %arg17: memref<1x1x32xf32, #tpu.memory_space<vmem>>, %arg18: memref<2x16x32xf32, #tpu.memory_space<vmem>>, %arg19: memref<2x16x32xf32, #tpu.memory_space<vmem>>) attributes {dimension_semantics = [#tpu.dimension_semantics<parallel>, #tpu.dimension_semantics<arbitrary>], iteration_bounds = array<i64: 1, 2>, scalar_prefetch = 0 : i64, scratch_operands = 1 : i64, tpu.core_type = #tpu.core_type<tc>, window_params = [{transform_indices = @transform_0, window_bounds = array<i64: 2, 16, 32>}, {pipeline_mode = #tpu.pipeline_mode<synchronous>, transform_indices = @transform_1, window_bounds = array<i64: 16, 32>}, {pipeline_mode = #tpu.pipeline_mode<synchronous>, transform_indices = @transform_2, window_bounds = array<i64: 1, 32>}, {pipeline_mode = #tpu.pipeline_mode<synchronous>, transform_indices = @transform_3, window_bounds = array<i64: 1, 32>}, {transform_indices = @transform_4, window_bounds = array<i64: 1, 1, 32>}, {transform_indices = @transform_5, window_bounds = array<i64: 1, 1, 32>}, {transform_indices = @transform_6, window_bounds = array<i64: 1, 32, 96>}, {transform_indices = @transform_7, window_bounds = array<i64: 1, 1, 96>}, {transform_indices = @transform_8, window_bounds = array<i64: 1, 32, 32>}, {transform_indices = @transform_9, window_bounds = array<i64: 1, 1, 32>}, {transform_indices = @transform_10, window_bounds = array<i64: 1, 1, 32>}, {transform_indices = @transform_11, window_bounds = array<i64: 1, 1, 32>}, {transform_indices = @transform_12, window_bounds = array<i64: 1, 32, 128>}, {transform_indices = @transform_13, window_bounds = array<i64: 1, 1, 128>}, {transform_indices = @transform_14, window_bounds = array<i64: 1, 128, 32>}, {transform_indices = @transform_15, window_bounds = array<i64: 1, 1, 32>}, {transform_indices = @transform_16, window_bounds = array<i64: 2, 16, 32>}]} {
    %c0_i32 = arith.constant 0 : i32
    %0 = arith.cmpi eq, %arg1, %c0_i32 : i32
    %1 = arith.extui %0 : i1 to i32
    %c0_i32_0 = arith.constant 0 : i32
    %2 = arith.cmpi ne, %1, %c0_i32_0 : i32
    scf.if %2 {
      %c0_63 = arith.constant 0 : index
      %c0_64 = arith.constant 0 : index
      %c0_65 = arith.constant 0 : index
      %148 = vector.load %arg2[%c0_63, %c0_64, %c0_65] : memref<2x16x32xf32, #tpu.memory_space<vmem>>, vector<2x16x32xf32>
      %c0_66 = arith.constant 0 : index
      %c0_67 = arith.constant 0 : index
      %149 = vector.load %arg3[%c0_66, %c0_67] : memref<16x32xf32, #tpu.memory_space<vmem>>, vector<16x32xf32>
      %150 = vector.shape_cast %149 : vector<16x32xf32> to vector<1x16x32xf32>
      %151 = vector.broadcast %150 : vector<1x16x32xf32> to vector<2x16x32xf32>
      %152 = arith.addf %148, %151 : vector<2x16x32xf32>
      %c0_68 = arith.constant 0 : index
      %c0_69 = arith.constant 0 : index
      %153 = vector.load %arg4[%c0_68, %c0_69] : memref<1x32xf32, #tpu.memory_space<vmem>>, vector<1x32xf32>
      %c0_70 = arith.constant 0 : index
      %c0_71 = arith.constant 0 : index
      %154 = vector.load %arg5[%c0_70, %c0_71] : memref<1x32xf32, #tpu.memory_space<vmem>>, vector<1x32xf32>
      %cst_72 = arith.constant dense<0.000000e+00> : vector<2x16xf32>
      %155 = vector.multi_reduction <add>, %152, %cst_72 [2] : vector<2x16x32xf32> to vector<2x16xf32>
      %156 = vector.shape_cast %155 : vector<2x16xf32> to vector<2x16x1xf32>
      %cst_73 = arith.constant 3.200000e+01 : f32
      %157 = vector.broadcast %cst_73 : f32 to vector<2x16x1xf32>
      %158 = arith.divf %156, %157 : vector<2x16x1xf32>
      %159 = vector.broadcast %158 : vector<2x16x1xf32> to vector<2x16x32xf32>
      %160 = arith.subf %152, %159 : vector<2x16x32xf32>
      %161 = arith.mulf %160, %160 : vector<2x16x32xf32>
      %cst_74 = arith.constant dense<0.000000e+00> : vector<2x16xf32>
      %162 = vector.multi_reduction <add>, %161, %cst_74 [2] : vector<2x16x32xf32> to vector<2x16xf32>
      %163 = vector.shape_cast %162 : vector<2x16xf32> to vector<2x16x1xf32>
      %cst_75 = arith.constant 3.200000e+01 : f32
      %164 = vector.broadcast %cst_75 : f32 to vector<2x16x1xf32>
      %165 = arith.divf %163, %164 : vector<2x16x1xf32>
      %166 = vector.broadcast %158 : vector<2x16x1xf32> to vector<2x16x32xf32>
      %167 = arith.subf %152, %166 : vector<2x16x32xf32>
      %cst_76 = arith.constant 9.99999974E-6 : f32
      %168 = vector.broadcast %cst_76 : f32 to vector<2x16x1xf32>
      %169 = arith.addf %165, %168 : vector<2x16x1xf32>
      %170 = math.rsqrt %169 : vector<2x16x1xf32>
      %171 = vector.broadcast %170 : vector<2x16x1xf32> to vector<2x16x32xf32>
      %172 = arith.mulf %167, %171 : vector<2x16x32xf32>
      %173 = vector.shape_cast %153 : vector<1x32xf32> to vector<1x1x32xf32>
      %174 = vector.broadcast %173 : vector<1x1x32xf32> to vector<2x16x32xf32>
      %175 = arith.mulf %172, %174 : vector<2x16x32xf32>
      %176 = vector.shape_cast %154 : vector<1x32xf32> to vector<1x1x32xf32>
      %177 = vector.broadcast %176 : vector<1x1x32xf32> to vector<2x16x32xf32>
      %178 = arith.addf %175, %177 : vector<2x16x32xf32>
      %c0_77 = arith.constant 0 : index
      %c0_78 = arith.constant 0 : index
      %c0_79 = arith.constant 0 : index
      %179 = vector.load %arg19[%c0_77, %c0_78, %c0_79] : memref<2x16x32xf32, #tpu.memory_space<vmem>>, vector<2x16x32xf32>
      tpu.vector_store %arg19[%c0_77, %c0_78, %c0_79], %178 {strides = array<i32>} : memref<2x16x32xf32, #tpu.memory_space<vmem>>, vector<2x16x32xf32>,
    } else {
    }
    %c0 = arith.constant 0 : index
    %c0_1 = arith.constant 0 : index
    %c0_2 = arith.constant 0 : index
    %3 = vector.load %arg19[%c0, %c0_1, %c0_2] : memref<2x16x32xf32, #tpu.memory_space<vmem>>, vector<2x16x32xf32>
    %c0_3 = arith.constant 0 : index
    %c0_4 = arith.constant 0 : index
    %c0_5 = arith.constant 0 : index
    %4 = vector.load %arg6[%c0_3, %c0_4, %c0_5] : memref<1x1x32xf32, #tpu.memory_space<vmem>>, vector<1x1x32xf32>
    %5 = vector.shape_cast %4 : vector<1x1x32xf32> to vector<1x32xf32>
    %c0_6 = arith.constant 0 : index
    %c0_7 = arith.constant 0 : index
    %c0_8 = arith.constant 0 : index
    %6 = vector.load %arg7[%c0_6, %c0_7, %c0_8] : memref<1x1x32xf32, #tpu.memory_space<vmem>>, vector<1x1x32xf32>
    %7 = vector.shape_cast %6 : vector<1x1x32xf32> to vector<1x32xf32>
    %cst = arith.constant dense<0.000000e+00> : vector<2x16xf32>
    %8 = vector.multi_reduction <add>, %3, %cst [2] : vector<2x16x32xf32> to vector<2x16xf32>
    %9 = vector.shape_cast %8 : vector<2x16xf32> to vector<2x16x1xf32>
    %cst_9 = arith.constant 3.200000e+01 : f32
    %10 = vector.broadcast %cst_9 : f32 to vector<2x16x1xf32>
    %11 = arith.divf %9, %10 : vector<2x16x1xf32>
    %12 = vector.broadcast %11 : vector<2x16x1xf32> to vector<2x16x32xf32>
    %13 = arith.subf %3, %12 : vector<2x16x32xf32>
    %14 = arith.mulf %13, %13 : vector<2x16x32xf32>
    %cst_10 = arith.constant dense<0.000000e+00> : vector<2x16xf32>
    %15 = vector.multi_reduction <add>, %14, %cst_10 [2] : vector<2x16x32xf32> to vector<2x16xf32>
    %16 = vector.shape_cast %15 : vector<2x16xf32> to vector<2x16x1xf32>
    %cst_11 = arith.constant 3.200000e+01 : f32
    %17 = vector.broadcast %cst_11 : f32 to vector<2x16x1xf32>
    %18 = arith.divf %16, %17 : vector<2x16x1xf32>
    %19 = vector.broadcast %11 : vector<2x16x1xf32> to vector<2x16x32xf32>
    %20 = arith.subf %3, %19 : vector<2x16x32xf32>
    %cst_12 = arith.constant 9.99999974E-6 : f32
    %21 = vector.broadcast %cst_12 : f32 to vector<2x16x1xf32>
    %22 = arith.addf %18, %21 : vector<2x16x1xf32>
    %23 = math.rsqrt %22 : vector<2x16x1xf32>
    %24 = vector.broadcast %23 : vector<2x16x1xf32> to vector<2x16x32xf32>
    %25 = arith.mulf %20, %24 : vector<2x16x32xf32>
    %26 = vector.shape_cast %5 : vector<1x32xf32> to vector<1x1x32xf32>
    %27 = vector.broadcast %26 : vector<1x1x32xf32> to vector<2x16x32xf32>
    %28 = arith.mulf %25, %27 : vector<2x16x32xf32>
    %29 = vector.shape_cast %7 : vector<1x32xf32> to vector<1x1x32xf32>
    %30 = vector.broadcast %29 : vector<1x1x32xf32> to vector<2x16x32xf32>
    %31 = arith.addf %28, %30 : vector<2x16x32xf32>
    %32 = vector.shape_cast %31 : vector<2x16x32xf32> to vector<32x32xf32>
    %33 = arith.truncf %32 : vector<32x32xf32> to vector<32x32xbf16>
    %c0_13 = arith.constant 0 : index
    %c0_14 = arith.constant 0 : index
    %c0_15 = arith.constant 0 : index
    %34 = vector.load %arg8[%c0_13, %c0_14, %c0_15] : memref<1x32x96xbf16, #tpu.memory_space<vmem>>, vector<1x32x96xbf16>
    %35 = vector.shape_cast %34 : vector<1x32x96xbf16> to vector<32x96xbf16>
    %cst_16 = arith.constant dense<0.000000e+00> : vector<32x96xf32>
    %36 = tpu.matmul %33, %35, %cst_16 {dimension_numbers = #tpu.dot_dimension_numbers<[1], [0], [0], [1], [0, 0, 1, 1], [], []>} : vector<32x32xbf16>, vector<32x96xbf16>, vector<32x96xf32> -> vector<32x96xf32>
    %c0_17 = arith.constant 0 : index
    %c0_18 = arith.constant 0 : index
    %c0_19 = arith.constant 0 : index
    %37 = vector.load %arg9[%c0_17, %c0_18, %c0_19] : memref<1x1x96xf32, #tpu.memory_space<vmem>>, vector<1x1x96xf32>
    %38 = vector.shape_cast %37 : vector<1x1x96xf32> to vector<1x96xf32>
    %39 = vector.broadcast %38 : vector<1x96xf32> to vector<32x96xf32>
    %40 = arith.addf %36, %39 : vector<32x96xf32>
    %41 = vector.extract_strided_slice %40 {offsets = [0, 0], sizes = [32, 32], strides = [1, 1]} : vector<32x96xf32> to vector<32x32xf32>
    %42 = vector.shape_cast %41 : vector<32x32xf32> to vector<32x4x8xf32>
    %43 = tpu.transpose %42, [1, 0, 2] : vector<32x4x8xf32> -> vector<4x32x8xf32>
    %44 = vector.shape_cast %43 : vector<4x32x8xf32> to vector<8x16x8xf32>
    %45 = vector.extract_strided_slice %40 {offsets = [0, 32], sizes = [32, 32], strides = [1, 1]} : vector<32x96xf32> to vector<32x32xf32>
    %46 = vector.shape_cast %45 : vector<32x32xf32> to vector<32x4x8xf32>
    %47 = tpu.transpose %46, [1, 0, 2] : vector<32x4x8xf32> -> vector<4x32x8xf32>
    %48 = vector.shape_cast %47 : vector<4x32x8xf32> to vector<8x16x8xf32>
    %49 = vector.extract_strided_slice %40 {offsets = [0, 64], sizes = [32, 32], strides = [1, 1]} : vector<32x96xf32> to vector<32x32xf32>
    %50 = vector.shape_cast %49 : vector<32x32xf32> to vector<32x4x8xf32>
    %51 = tpu.transpose %50, [1, 0, 2] : vector<32x4x8xf32> -> vector<4x32x8xf32>
    %52 = vector.shape_cast %51 : vector<4x32x8xf32> to vector<8x16x8xf32>
    %53 = arith.truncf %44 : vector<8x16x8xf32> to vector<8x16x8xbf16>
    %54 = arith.truncf %48 : vector<8x16x8xf32> to vector<8x16x8xbf16>
    "tpu.trace_start"() <{level = 10 : i32, message = "gqd,gkd->gqk"}> : () -> ()
    %cst_20 = arith.constant dense<0.000000e+00> : vector<8x16x16xf32>
    %55 = tpu.matmul %53, %54, %cst_20 {dimension_numbers = #tpu.dot_dimension_numbers<[2], [2], [1], [1], [0, 0, 0, 1, 1, 1], [0], [0]>} : vector<8x16x8xbf16>, vector<8x16x8xbf16>, vector<8x16x16xf32> -> vector<8x16x16xf32>
    "tpu.trace_stop"() : () -> ()
    %56 = tpu.iota {dimensions = array<i32: 2>} : vector<1x1x16xi32>
    %c5_i32 = arith.constant 5 : i32
    %57 = vector.broadcast %c5_i32 : i32 to vector<1x1x16xi32>
    %58 = arith.cmpi slt, %56, %57 : vector<1x1x16xi32>
    %cst_21 = arith.constant -1.000000e+30 : f32
    %59 = vector.shape_cast %58 : vector<1x1x16xi1> to vector<1x1x16xi1>
    %60 = vector.broadcast %59 : vector<1x1x16xi1> to vector<8x16x16xi1>
    %61 = vector.broadcast %cst_21 : f32 to vector<8x16x16xf32>
    %62 = arith.select %60, %55, %61 : vector<8x16x16xi1>, vector<8x16x16xf32>
    %cst_22 = arith.constant dense<0xFF800000> : vector<8x16xf32>
    %63 = vector.multi_reduction <maximumf>, %62, %cst_22 [2] : vector<8x16x16xf32> to vector<8x16xf32>
    %64 = vector.shape_cast %63 : vector<8x16xf32> to vector<8x16x1xf32>
    %65 = vector.broadcast %64 : vector<8x16x1xf32> to vector<8x16x16xf32>
    %66 = arith.subf %62, %65 : vector<8x16x16xf32>
    %67 = math.exp %66 : vector<8x16x16xf32>
    %cst_23 = arith.constant dense<0.000000e+00> : vector<8x16xf32>
    %68 = vector.multi_reduction <add>, %67, %cst_23 [2] : vector<8x16x16xf32> to vector<8x16xf32>
    %69 = vector.shape_cast %68 : vector<8x16xf32> to vector<8x16x1xf32>
    %70 = tpu.reciprocal %69 {approx = true} : vector<8x16x1xf32> -> vector<8x16x1xf32>
    %71 = vector.broadcast %70 : vector<8x16x1xf32> to vector<8x16x16xf32>
    %72 = arith.mulf %67, %71 : vector<8x16x16xf32>
    %73 = arith.truncf %72 : vector<8x16x16xf32> to vector<8x16x16xbf16>
    %74 = arith.truncf %52 : vector<8x16x8xf32> to vector<8x16x8xbf16>
    "tpu.trace_start"() <{level = 10 : i32, message = "gqk,gkd->gqd"}> : () -> ()
    %cst_24 = arith.constant dense<0.000000e+00> : vector<8x16x8xf32>
    %75 = tpu.matmul %73, %74, %cst_24 {dimension_numbers = #tpu.dot_dimension_numbers<[2], [1], [1], [2], [0, 0, 0, 1, 1, 2], [0], [0]>} : vector<8x16x16xbf16>, vector<8x16x8xbf16>, vector<8x16x8xf32> -> vector<8x16x8xf32>
    "tpu.trace_stop"() : () -> ()
    %76 = vector.shape_cast %75 : vector<8x16x8xf32> to vector<4x32x8xf32>
    %77 = tpu.transpose %76, [1, 0, 2] : vector<4x32x8xf32> -> vector<32x4x8xf32>
    %78 = vector.shape_cast %77 : vector<32x4x8xf32> to vector<32x32xf32>
    %79 = arith.truncf %78 : vector<32x32xf32> to vector<32x32xbf16>
    %c0_25 = arith.constant 0 : index
    %c0_26 = arith.constant 0 : index
    %c0_27 = arith.constant 0 : index
    %80 = vector.load %arg10[%c0_25, %c0_26, %c0_27] : memref<1x32x32xbf16, #tpu.memory_space<vmem>>, vector<1x32x32xbf16>
    %81 = vector.shape_cast %80 : vector<1x32x32xbf16> to vector<32x32xbf16>
    %cst_28 = arith.constant dense<0.000000e+00> : vector<32x32xf32>
    %82 = tpu.matmul %79, %81, %cst_28 {dimension_numbers = #tpu.dot_dimension_numbers<[1], [0], [0], [1], [0, 0, 1, 1], [], []>} : vector<32x32xbf16>, vector<32x32xbf16>, vector<32x32xf32> -> vector<32x32xf32>
    %c0_29 = arith.constant 0 : index
    %c0_30 = arith.constant 0 : index
    %c0_31 = arith.constant 0 : index
    %83 = vector.load %arg11[%c0_29, %c0_30, %c0_31] : memref<1x1x32xf32, #tpu.memory_space<vmem>>, vector<1x1x32xf32>
    %84 = vector.shape_cast %83 : vector<1x1x32xf32> to vector<1x32xf32>
    %85 = vector.broadcast %84 : vector<1x32xf32> to vector<32x32xf32>
    %86 = arith.addf %82, %85 : vector<32x32xf32>
    %87 = vector.shape_cast %86 : vector<32x32xf32> to vector<2x16x32xf32>
    %88 = arith.addf %3, %87 : vector<2x16x32xf32>
    %c0_32 = arith.constant 0 : index
    %c0_33 = arith.constant 0 : index
    %c0_34 = arith.constant 0 : index
    %89 = vector.load %arg12[%c0_32, %c0_33, %c0_34] : memref<1x1x32xf32, #tpu.memory_space<vmem>>, vector<1x1x32xf32>
    %90 = vector.shape_cast %89 : vector<1x1x32xf32> to vector<1x32xf32>
    %c0_35 = arith.constant 0 : index
    %c0_36 = arith.constant 0 : index
    %c0_37 = arith.constant 0 : index
    %91 = vector.load %arg13[%c0_35, %c0_36, %c0_37] : memref<1x1x32xf32, #tpu.memory_space<vmem>>, vector<1x1x32xf32>
    %92 = vector.shape_cast %91 : vector<1x1x32xf32> to vector<1x32xf32>
    %cst_38 = arith.constant dense<0.000000e+00> : vector<2x16xf32>
    %93 = vector.multi_reduction <add>, %88, %cst_38 [2] : vector<2x16x32xf32> to vector<2x16xf32>
    %94 = vector.shape_cast %93 : vector<2x16xf32> to vector<2x16x1xf32>
    %cst_39 = arith.constant 3.200000e+01 : f32
    %95 = vector.broadcast %cst_39 : f32 to vector<2x16x1xf32>
    %96 = arith.divf %94, %95 : vector<2x16x1xf32>
    %97 = vector.broadcast %96 : vector<2x16x1xf32> to vector<2x16x32xf32>
    %98 = arith.subf %88, %97 : vector<2x16x32xf32>
    %99 = arith.mulf %98, %98 : vector<2x16x32xf32>
    %cst_40 = arith.constant dense<0.000000e+00> : vector<2x16xf32>
    %100 = vector.multi_reduction <add>, %99, %cst_40 [2] : vector<2x16x32xf32> to vector<2x16xf32>
    %101 = vector.shape_cast %100 : vector<2x16xf32> to vector<2x16x1xf32>
    %cst_41 = arith.constant 3.200000e+01 : f32
    %102 = vector.broadcast %cst_41 : f32 to vector<2x16x1xf32>
    %103 = arith.divf %101, %102 : vector<2x16x1xf32>
    %104 = vector.broadcast %96 : vector<2x16x1xf32> to vector<2x16x32xf32>
    %105 = arith.subf %88, %104 : vector<2x16x32xf32>
    %cst_42 = arith.constant 9.99999974E-6 : f32
    %106 = vector.broadcast %cst_42 : f32 to vector<2x16x1xf32>
    %107 = arith.addf %103, %106 : vector<2x16x1xf32>
    %108 = math.rsqrt %107 : vector<2x16x1xf32>
    %109 = vector.broadcast %108 : vector<2x16x1xf32> to vector<2x16x32xf32>
    %110 = arith.mulf %105, %109 : vector<2x16x32xf32>
    %111 = vector.shape_cast %90 : vector<1x32xf32> to vector<1x1x32xf32>
    %112 = vector.broadcast %111 : vector<1x1x32xf32> to vector<2x16x32xf32>
    %113 = arith.mulf %110, %112 : vector<2x16x32xf32>
    %114 = vector.shape_cast %92 : vector<1x32xf32> to vector<1x1x32xf32>
    %115 = vector.broadcast %114 : vector<1x1x32xf32> to vector<2x16x32xf32>
    %116 = arith.addf %113, %115 : vector<2x16x32xf32>
    %117 = vector.shape_cast %116 : vector<2x16x32xf32> to vector<32x32xf32>
    %118 = arith.truncf %117 : vector<32x32xf32> to vector<32x32xbf16>
    %c0_43 = arith.constant 0 : index
    %c0_44 = arith.constant 0 : index
    %c0_45 = arith.constant 0 : index
    %119 = vector.load %arg14[%c0_43, %c0_44, %c0_45] : memref<1x32x128xbf16, #tpu.memory_space<vmem>>, vector<1x32x128xbf16>
    %120 = vector.shape_cast %119 : vector<1x32x128xbf16> to vector<32x128xbf16>
    %cst_46 = arith.constant dense<0.000000e+00> : vector<32x128xf32>
    %121 = tpu.matmul %118, %120, %cst_46 {dimension_numbers = #tpu.dot_dimension_numbers<[1], [0], [0], [1], [0, 0, 1, 1], [], []>} : vector<32x32xbf16>, vector<32x128xbf16>, vector<32x128xf32> -> vector<32x128xf32>
    %c0_47 = arith.constant 0 : index
    %c0_48 = arith.constant 0 : index
    %c0_49 = arith.constant 0 : index
    %122 = vector.load %arg15[%c0_47, %c0_48, %c0_49] : memref<1x1x128xf32, #tpu.memory_space<vmem>>, vector<1x1x128xf32>
    %123 = vector.shape_cast %122 : vector<1x1x128xf32> to vector<1x128xf32>
    %124 = vector.broadcast %123 : vector<1x128xf32> to vector<32x128xf32>
    %125 = arith.addf %121, %124 : vector<32x128xf32>
    %cst_50 = arith.constant 1.702000e+00 : f32
    %126 = vector.broadcast %cst_50 : f32 to vector<32x128xf32>
    %127 = arith.mulf %126, %125 : vector<32x128xf32>
    %128 = arith.negf %127 : vector<32x128xf32>
    %129 = math.exp %128 : vector<32x128xf32>
    %cst_51 = arith.constant 1.000000e+00 : f32
    %130 = vector.broadcast %cst_51 : f32 to vector<32x128xf32>
    %131 = arith.addf %130, %129 : vector<32x128xf32>
    %132 = arith.divf %130, %131 : vector<32x128xf32>
    %133 = arith.mulf %125, %132 : vector<32x128xf32>
    %134 = arith.truncf %133 : vector<32x128xf32> to vector<32x128xbf16>
    %c0_52 = arith.constant 0 : index
    %c0_53 = arith.constant 0 : index
    %c0_54 = arith.constant 0 : index
    %135 = vector.load %arg16[%c0_52, %c0_53, %c0_54] : memref<1x128x32xbf16, #tpu.memory_space<vmem>>, vector<1x128x32xbf16>
    %136 = vector.shape_cast %135 : vector<1x128x32xbf16> to vector<128x32xbf16>
    %cst_55 = arith.constant dense<0.000000e+00> : vector<32x32xf32>
    %137 = tpu.matmul %134, %136, %cst_55 {dimension_numbers = #tpu.dot_dimension_numbers<[1], [0], [0], [1], [0, 0, 1, 1], [], []>} : vector<32x128xbf16>, vector<128x32xbf16>, vector<32x32xf32> -> vector<32x32xf32>
    %c0_56 = arith.constant 0 : index
    %c0_57 = arith.constant 0 : index
    %c0_58 = arith.constant 0 : index
    %138 = vector.load %arg17[%c0_56, %c0_57, %c0_58] : memref<1x1x32xf32, #tpu.memory_space<vmem>>, vector<1x1x32xf32>
    %139 = vector.shape_cast %138 : vector<1x1x32xf32> to vector<1x32xf32>
    %140 = vector.broadcast %139 : vector<1x32xf32> to vector<32x32xf32>
    %141 = arith.addf %137, %140 : vector<32x32xf32>
    %142 = vector.shape_cast %141 : vector<32x32xf32> to vector<2x16x32xf32>
    %143 = arith.addf %88, %142 : vector<2x16x32xf32>
    %c0_59 = arith.constant 0 : index
    %c0_60 = arith.constant 0 : index
    %c0_61 = arith.constant 0 : index
    %144 = vector.load %arg19[%c0_59, %c0_60, %c0_61] : memref<2x16x32xf32, #tpu.memory_space<vmem>>, vector<2x16x32xf32>
    tpu.vector_store %arg19[%c0_59, %c0_60, %c0_61], %143 {strides = array<i32>} : memref<2x16x32xf32, #tpu.memory_space<vmem>>, vector<2x16x32xf32>,
    %c1_i32 = arith.constant 1 : i32
    %145 = arith.cmpi eq, %arg1, %c1_i32 : i32
    %146 = arith.extui %145 : i1 to i32
    %c0_i32_62 = arith.constant 0 : i32
    %147 = arith.cmpi ne, %146, %c0_i32_62 : i32
    scf.if %147 {
      %c0_63 = arith.constant 0 : index
      %c0_64 = arith.constant 0 : index
      %c0_65 = arith.constant 0 : index
      %148 = vector.load %arg18[%c0_63, %c0_64, %c0_65] : memref<2x16x32xf32, #tpu.memory_space<vmem>>, vector<2x16x32xf32>
      tpu.vector_store %arg18[%c0_63, %c0_64, %c0_65], %143 {strides = array<i32>} : memref<2x16x32xf32, #tpu.memory_space<vmem>>, vector<2x16x32xf32>,
    } else {
    }
    return
  }
  func.func @transform_0(%arg0: i32, %arg1: i32) -> (i32, i32, i32) {
    %c0_i32 = arith.constant 0 : i32
    %c0_i32_0 = arith.constant 0 : i32
    %c0_i32_1 = arith.constant 0 : i32
    return %arg0, %c0_i32, %c0_i32_0 : i32, i32, i32
  }
  func.func @transform_1(%arg0: i32, %arg1: i32) -> (i32, i32) {
    %c0_i32 = arith.constant 0 : i32
    %c0_i32_0 = arith.constant 0 : i32
    %c0_i32_1 = arith.constant 0 : i32
    return %c0_i32, %c0_i32_0 : i32, i32
  }
  func.func @transform_2(%arg0: i32, %arg1: i32) -> (i32, i32) {
    %c0_i32 = arith.constant 0 : i32
    %c0_i32_0 = arith.constant 0 : i32
    %c0_i32_1 = arith.constant 0 : i32
    return %c0_i32, %c0_i32_0 : i32, i32
  }
  func.func @transform_3(%arg0: i32, %arg1: i32) -> (i32, i32) {
    %c0_i32 = arith.constant 0 : i32
    %c0_i32_0 = arith.constant 0 : i32
    %c0_i32_1 = arith.constant 0 : i32
    return %c0_i32, %c0_i32_0 : i32, i32
  }
  func.func @transform_4(%arg0: i32, %arg1: i32) -> (i32, i32, i32) {
    %c0_i32 = arith.constant 0 : i32
    %c0_i32_0 = arith.constant 0 : i32
    %c0_i32_1 = arith.constant 0 : i32
    return %arg1, %c0_i32, %c0_i32_0 : i32, i32, i32
  }
  func.func @transform_5(%arg0: i32, %arg1: i32) -> (i32, i32, i32) {
    %c0_i32 = arith.constant 0 : i32
    %c0_i32_0 = arith.constant 0 : i32
    %c0_i32_1 = arith.constant 0 : i32
    return %arg1, %c0_i32, %c0_i32_0 : i32, i32, i32
  }
  func.func @transform_6(%arg0: i32, %arg1: i32) -> (i32, i32, i32) {
    %c0_i32 = arith.constant 0 : i32
    %c0_i32_0 = arith.constant 0 : i32
    %c0_i32_1 = arith.constant 0 : i32
    return %arg1, %c0_i32, %c0_i32_0 : i32, i32, i32
  }
  func.func @transform_7(%arg0: i32, %arg1: i32) -> (i32, i32, i32) {
    %c0_i32 = arith.constant 0 : i32
    %c0_i32_0 = arith.constant 0 : i32
    %c0_i32_1 = arith.constant 0 : i32
    return %arg1, %c0_i32, %c0_i32_0 : i32, i32, i32
  }
  func.func @transform_8(%arg0: i32, %arg1: i32) -> (i32, i32, i32) {
    %c0_i32 = arith.constant 0 : i32
    %c0_i32_0 = arith.constant 0 : i32
    %c0_i32_1 = arith.constant 0 : i32
    return %arg1, %c0_i32, %c0_i32_0 : i32, i32, i32
  }
  func.func @transform_9(%arg0: i32, %arg1: i32) -> (i32, i32, i32) {
    %c0_i32 = arith.constant 0 : i32
    %c0_i32_0 = arith.constant 0 : i32
    %c0_i32_1 = arith.constant 0 : i32
    return %arg1, %c0_i32, %c0_i32_0 : i32, i32, i32
  }
  func.func @transform_10(%arg0: i32, %arg1: i32) -> (i32, i32, i32) {
    %c0_i32 = arith.constant 0 : i32
    %c0_i32_0 = arith.constant 0 : i32
    %c0_i32_1 = arith.constant 0 : i32
    return %arg1, %c0_i32, %c0_i32_0 : i32, i32, i32
  }
  func.func @transform_11(%arg0: i32, %arg1: i32) -> (i32, i32, i32) {
    %c0_i32 = arith.constant 0 : i32
    %c0_i32_0 = arith.constant 0 : i32
    %c0_i32_1 = arith.constant 0 : i32
    return %arg1, %c0_i32, %c0_i32_0 : i32, i32, i32
  }
  func.func @transform_12(%arg0: i32, %arg1: i32) -> (i32, i32, i32) {
    %c0_i32 = arith.constant 0 : i32
    %c0_i32_0 = arith.constant 0 : i32
    %c0_i32_1 = arith.constant 0 : i32
    return %arg1, %c0_i32, %c0_i32_0 : i32, i32, i32
  }
  func.func @transform_13(%arg0: i32, %arg1: i32) -> (i32, i32, i32) {
    %c0_i32 = arith.constant 0 : i32
    %c0_i32_0 = arith.constant 0 : i32
    %c0_i32_1 = arith.constant 0 : i32
    return %arg1, %c0_i32, %c0_i32_0 : i32, i32, i32
  }
  func.func @transform_14(%arg0: i32, %arg1: i32) -> (i32, i32, i32) {
    %c0_i32 = arith.constant 0 : i32
    %c0_i32_0 = arith.constant 0 : i32
    %c0_i32_1 = arith.constant 0 : i32
    return %arg1, %c0_i32, %c0_i32_0 : i32, i32, i32
  }
  func.func @transform_15(%arg0: i32, %arg1: i32) -> (i32, i32, i32) {
    %c0_i32 = arith.constant 0 : i32
    %c0_i32_0 = arith.constant 0 : i32
    %c0_i32_1 = arith.constant 0 : i32
    return %arg1, %c0_i32, %c0_i32_0 : i32, i32, i32
  }
  func.func @transform_16(%arg0: i32, %arg1: i32) -> (i32, i32, i32) {
    %c0_i32 = arith.constant 0 : i32
    %c0_i32_0 = arith.constant 0 : i32
    %c0_i32_1 = arith.constant 0 : i32
    return %arg0, %c0_i32, %c0_i32_0 : i32, i32, i32
  }
}

</mosaic_0001>

<bundles_post_ra>
// kernel: encode_image.2
= control target key start
LH: loop header
LB: loop body
LE: loop exit
PB: predicated region body
PF: predicated region fallthrough
CT: control target
= control target key end

     0   :  { %v195_v0 = vmov 0   ;;  %vm115_vm0 = vcmask 523264   ;;  %vm159_vm1 = vcmask 261120   ;;  %s253_s1 = inlined_call_operand.vmem [shape: bf16[192,32], index: 1, kind: input, shape index: {}]   ;;  %s254_s0 = inlined_call_operand.vmem [shape: bf16[8,192], index: 0, kind: input, shape index: {}]   ;;  %s255_s2 = inlined_call_operand.vmem [shape: f32[8,32], index: 2, kind: output, shape index: {}]  }
   0x1   :  { %119 = vmatprep.subr.bf16.mxu0 %v195_v0  ;;  %v181_v1 = vld [vmem:[%s253_s1 + $0x38] sm:$0xff]   ;;  %v182_v2 = vld [vmem:[%s253_s1 + $0x30] sm:$0xff]   ;;  %v183_v3 = vld [vmem:[%s253_s1 + $0x28] sm:$0xff]  }
   0x2   :  { %120 = vmatpush1.bf16.msra.mxu0 %v181_v1  ;;  %v184_v4 = vld [vmem:[%s253_s1 + $0x20] sm:$0xff]   ;;  %v185_v7 = vld [vmem:[%s253_s1 + $0x18] sm:$0xff]   ;;  %v186_v8 = vld [vmem:[%s253_s1 + $0x10] sm:$0xff]  }
   0x3   :  { %121 = vmatprep.subr.bf16.mxu0 %v195_v0  ;;  %v12_v5 = vld [vmem:[%s254_s0] sm:$0xff]  ;;  %v187_v9 = vld [vmem:[%s253_s1 + $0x8] sm:$0xff]   ;;  %v189_v11 = vld [vmem:[%s253_s1 + $0x58] sm:$0xff]  }
   0x4   :  { %v166_v6 = vcombine.high %v12_v5, %v12_v5  ;;  %v188_v10 = vld [vmem:[%s253_s1] sm:$0xff]   ;;  %v190_v12 = vld [vmem:[%s253_s1 + $0x50] sm:$0xff]   ;;  %v191_v13 = vld [vmem:[%s253_s1 + $0x48] sm:$0xff]   ;;  %v165_v15 = vcombine.low %v12_v5, %v12_v5 }
   0x5   :  { %v192_v14 = vld [vmem:[%s253_s1 + $0x40] sm:$0xff]  }
   0x6   :  { %122 = vmatpush1.bf16.msra.mxu0 %v182_v2  ;;  %179 = vmatprep.mubr.msk.bf16.mxu0 %vm115_vm0, %v166_v6 }
   0x7   :  { %123 = vmatprep.subr.bf16.mxu0 %v195_v0 }
   0xa   :  { %124 = vmatpush1.bf16.msra.mxu0 %v183_v3 }
   0xb   :  { %125 = vmatprep.subr.bf16.mxu0 %v195_v0 }
   0xe   :  { %126 = vmatpush1.bf16.msra.mxu0 %v184_v4 }
   0xf   :  { %127 = vmatprep.subr.bf16.mxu0 %v195_v0 }
  0x12   :  { %128 = vmatpush1.bf16.msra.mxu0 %v185_v7 }
  0x13   :  { %129 = vmatprep.subr.bf16.mxu0 %v195_v0 }
  0x16   :  { %130 = vmatpush1.bf16.msra.mxu0 %v186_v8 }
  0x17   :  { %131 = vmatprep.subr.bf16.mxu0 %v195_v0 }
  0x1a   :  { %132 = vmatpush1.bf16.msra.mxu0 %v187_v9 }
  0x1b   :  { %133 = vmatprep.subr.bf16.mxu0 %v195_v0 }
  0x1e   :  { %134 = vmatpush1.bf16.msra.mxu0 %v188_v10 }
  0x1f   :  { %143 = vmatprep.subr.bf16.mxu0 %v195_v0 }
  0x22   :  { %144 = vmatpush2.bf16.msra.mxu0 %v189_v11 }
  0x23   :  { %145 = vmatprep.subr.bf16.mxu0 %v195_v0 }
  0x26   :  { %146 = vmatpush2.bf16.msra.mxu0 %v190_v12 }
  0x27   :  { %147 = vmatprep.subr.bf16.mxu0 %v195_v0 }
  0x2a   :  { %148 = vmatpush2.bf16.msra.mxu0 %v191_v13 }
  0x2b   :  { %149 = vmatprep.subr.bf16.mxu0 %v195_v0 }
  0x2e   :  { %150 = vmatpush2.bf16.msra.mxu0 %v192_v14 }
  0x31   :  { %152 = vmatmul.mubr.bf16.vlgmr.msra.gmra.mxu0 %v165_v15 }
  0xf1   :  { %v153_v16 = vpop.f32.mrf.mxu0 }
  0xf2   :  { %160 = vst.msk [vmem:[%s255_s2] sm:$0xff] %vm159_vm1, %v153_v16 }
  0xf3   :  { %v155_v17 = vpop.f32.mrf.mxu0 }
  0xf5   :  { %v156_v18 = vpop.f32.mrf.mxu0 }
  0xf7   :  { %v157_v19 = vpop.f32.mrf.mxu0 }

// kernel: encode_image.3
= control target key start
LH: loop header
LB: loop body
LE: loop exit
PB: predicated region body
PF: predicated region fallthrough
CT: control target
= control target key end

     0   :  { %s5524_s21 = smov 0   ;;  %s5526_s22 = smov 0   ;;  %s6764_s0 = inlined_call_operand.vmem [shape: f32[2,16,32], index: 0, kind: input, shape index: {}, may-alias: {0,16}]   ;;  %s6765_s1 = inlined_call_operand.vmem [shape: f32[16,32], index: 1, kind: input, shape index: {}]   ;;  %s6766_s2 = inlined_call_operand.vmem [shape: f32[1,32], index: 2, kind: input, shape index: {}]   ;;  %s6767_s3 = inlined_call_operand.vmem [shape: f32[1,32], index: 3, kind: input, shape index: {}]   ;;  %s6768_s4 = inlined_call_operand.vmem [shape: f32[2,1,32], index: 4, kind: input, shape index: {}]   ;;  %s6769_s5 = inlined_call_operand.vmem [shape: f32[2,1,32], index: 5, kind: input, shape index: {}]   ;;  %s6770_s6 = inlined_call_operand.vmem [shape: bf16[2,32,96], index: 6, kind: input, shape index: {}]   ;;  %s6771_s7 = inlined_call_operand.vmem [shape: f32[2,1,96], index: 7, kind: input, shape index: {}]   ;;  %s6772_s8 = inlined_call_operand.vmem [shape: bf16[2,32,32], index: 8, kind: input, shape index: {}]   ;;  %s6773_s9 = inlined_call_operand.vmem [shape: f32[2,1,32], index: 9, kind: input, shape index: {}]   ;;  %s6774_s10 = inlined_call_operand.vmem [shape: f32[2,1,32], index: 10, kind: input, shape index: {}]   ;;  %s6775_s11 = inlined_call_operand.vmem [shape: f32[2,1,32], index: 11, kind: input, shape index: {}]   ;;  %s6776_s12 = inlined_call_operand.vmem [shape: bf16[2,32,128], index: 12, kind: input, shape index: {}]   ;;  %s6777_s13 = inlined_call_operand.vmem [shape: f32[2,1,128], index: 13, kind: input, shape index: {}]   ;;  %s6778_s14 = inlined_call_operand.vmem [shape: bf16[2,128,32], index: 14, kind: input, shape index: {}]   ;;  %s6779_s15 = inlined_call_operand.vmem [shape: f32[2,1,32], index: 15, kind: input, shape index: {}]   ;;  %s6780_s16 = inlined_call_operand.vmem [shape: f32[2,16,32], index: 16, kind: output, shape index: {}, may-alias: {0,16}]  }
   0x1   :  { %6794 = sst [smem:[#allocation12_spill]] %s6764_s0  ;;  %s5528_s23 = smov 0  }
   0x2   :  { %6795 = sst [smem:[#allocation13_spill]] %s6768_s4 }
   0x3   :  { %6796 = sst [smem:[#allocation14_spill]] %s6769_s5 }
   0x4   :  { %6797 = sst [smem:[#allocation15_spill]] %s6770_s6 }
   0x5   :  { %6798 = sst [smem:[#allocation16_spill]] %s6772_s8 }
   0x6   :  { %6799 = sst [smem:[#allocation17_spill]] %s6780_s16 }
   0x7 LB: > { %6800 = sst [smem:[#allocation3_spill]] %s5421_s22  ;;  %s35_s24 = sadd.s32 1, %s5421_s22  ;;  %s5425_s23 = sphi %s5528_s23, %s26_s23   ;;  %s5421_s22 = sphi %s5526_s22, %s6836_s22   ;;  %s5417_s21 = sphi %s5524_s21, %s6835_s21  }
   0x8   : > { %6801 = sst [smem:[#allocation4_spill]] %s5425_s23  ;;  %p4920_p0 = scmp.ge.s32.totalorder %s5425_s23, 1 }
   0x9   : > { %p36_p1 = scmp.ge.s32.totalorder %s35_s24, 2  ;;  %p580_p2 = scmp.lt.s32.totalorder %s5425_s23, 3 }
   0xb   : > { %s6838_s24 = smov (%p36_p1, %s35_s24), 0  ;;  %p581_p3 = pnand %p4920_p0, %p580_p2 }
   0xc   : > { %6802 = sst [smem:[#allocation5_spill]] %s6838_s24 }
   0xd   : > { %584 = sbr.rel (%p581_p3) target bundleno = 3069 (0xbfd), region = 84 }
  0x12   : > { %p683_p4 = scmp.lt.s32.totalorder %s5417_s21, 1  ;;  %s6805_s6 = sld [smem:[#allocation15_spill]] }
  0x13   : > { %s6806_s8 = sld [smem:[#allocation16_spill]]  ;;  %p4929_p5 = scmp.ne.s32.totalorder %s5417_s21, 0 }
  0x14   : > { %s5546_s25 = scalar_select %p683_p4, %s5417_s21, 1 }
  0x15   : > { %s6808_s26 = sld [smem:[#allocation12_spill]] (!%p4929_p5) }
  0x16   : > { %s5017_s17 = sshll.u32 %s5546_s25, 4  ;;  %s707_s5 = scalar_lea.vmem %s6774_s10, %s5546_s25 }
  0x17   : > { %s710_s20 = scalar_lea.vmem %s6775_s11, %s5546_s25  ;;  %s726_s18 = scalar_lea.vmem %s6779_s15, %s5546_s25 }
  0x18   : > { %s5564_s24 = scalar_lea.vmem %s6805_s6, %s5017_s17  ;;  %s5586_s6 = scalar_lea.vmem %s6776_s12, %s5017_s17 }
  0x19   : > { %s5569_s16 = scalar_lea.vmem %s6806_s8, %s5017_s17  ;;  %s718_s8 = scalar_lea.vmem %s6777_s13, %s5546_s25 }
  0x1a   : > { %6807 = sst [smem:[#allocation6_spill]] %s5569_s16  ;;  %s5020_s16 = sshll.u32 %s5546_s25, 6 }
  0x1b   : > { %s5596_s29 = scalar_lea.vmem %s6778_s14, %s5020_s16  ;;  %738 = sbr.rel (%p4929_p5) target bundleno = 353 (0x161), region = 88 }
  0x20   : > { %v739_v0 = vld [vmem:[%s6808_s26] sm:$0xff]  ;;  %vm751_vm0 = vcmask 261120   ;;  %v741_v2 = vld [vmem:[%s6808_s26 + $0x10] sm:$0xff]  ;;  %v740_v5 = vld [vmem:[%s6808_s26 + $0x8] sm:$0xff] }
  0x21   : > { %v743_v1 = vld [vmem:[%s6765_s1] sm:$0xff]  ;;  %v744_v6 = vld [vmem:[%s6765_s1 + $0x8] sm:$0xff]  ;;  %v742_v7 = vld [vmem:[%s6808_s26 + $0x18] sm:$0xff] }
  0x22   : > { %v745_v3 = vadd.f32 %v743_v1, %v739_v0  ;;  %v747_v4 = vadd.f32 %v743_v1, %v741_v2  ;;  %v746_v8 = vadd.f32 %v744_v6, %v740_v5  ;;  %v748_v9 = vadd.f32 %v744_v6, %v742_v7  ;;  %v4930_v47 = vld [vmem:[%s6766_s2] ss:$0 sm:$0xff] }
  0x23   : > { %v4931_v49 = vld [vmem:[%s6767_s3] ss:$0 sm:$0xff] }
  0x24   : > { %v752_v10 = vsel %vm751_vm0, %v745_v3, 0.0  ;;  %v758_v11 = vsel %vm751_vm0, %v747_v4, 0.0  ;;  %v755_v12 = vsel %vm751_vm0, %v746_v8, 0.0  ;;  %v761_v13 = vsel %vm751_vm0, %v748_v9, 0.0 }
  0x25   : > { %753 = vadd.xlane.f32.xlu0 %v752_v10  ;;  %759 = vadd.xlane.f32.xlu1 %v758_v11 }
  0x29   : > { %756 = vadd.xlane.f32.xlu0 %v755_v12  ;;  %762 = vadd.xlane.f32.xlu1 %v761_v13 }
  0xae   : > { %v754_v14 = vpop.xlane.xlu0 %753  ;;  %v760_v15 = vpop.xlane.xlu1 %759 }
  0xaf   : > { %v765_v16 = vmul.f32 0.03125, %v754_v14  ;;  %v767_v17 = vmul.f32 0.03125, %v760_v15 }
  0xb1   : > { %v769_v18 = vsub.f32 %v745_v3, %v765_v16  ;;  %v771_v19 = vsub.f32 %v747_v4, %v767_v17 }
  0xb2   : > { %v757_v20 = vpop.xlane.xlu0 %756  ;;  %v763_v21 = vpop.xlane.xlu1 %762 }
  0xb3   : > { %v766_v22 = vmul.f32 0.03125, %v757_v20  ;;  %v768_v23 = vmul.f32 0.03125, %v763_v21  ;;  %v773_v24 = vmul.f32 %v769_v18, %v769_v18  ;;  %v775_v25 = vmul.f32 %v771_v19, %v771_v19 }
  0xb5   : > { %v770_v26 = vsub.f32 %v746_v8, %v766_v22  ;;  %v772_v27 = vsub.f32 %v748_v9, %v768_v23  ;;  %v777_v28 = vsel %vm751_vm0, %v773_v24, 0.0  ;;  %v783_v29 = vsel %vm751_vm0, %v775_v25, 0.0 }
  0xb6   : > { %778 = vadd.xlane.f32.xlu0 %v777_v28 }
  0xb7   : > { %v774_v30 = vmul.f32 %v770_v26, %v770_v26  ;;  %v776_v31 = vmul.f32 %v772_v27, %v772_v27 }
  0xb9   : > { %v780_v32 = vsel %vm751_vm0, %v774_v30, 0.0  ;;  %v786_v33 = vsel %vm751_vm0, %v776_v31, 0.0 }
  0xba   : > { %784 = vadd.xlane.f32.xlu0 %v783_v29  ;;  %781 = vadd.xlane.f32.xlu1 %v780_v32 }
  0xbe   : > { %787 = vadd.xlane.f32.xlu1 %v786_v33 }
 0x13f   : > { %v779_v34 = vpop.xlane.xlu0 %778 }
 0x140   : > { %v789_v35 = vmul.f32 0.03125, %v779_v34 }
 0x142   : > { %v793_v36 = vadd.f32 1e-05, %v789_v35 }
 0x143   : > { %v782_v37 = vpop.xlane.xlu1 %781  ;;  %v785_v38 = vpop.xlane.xlu0 %784 }
 0x144   : > { %5251 = vrsqrt.f32 %v793_v36  ;;  %v790_v39 = vmul.f32 0.03125, %v782_v37  ;;  %v791_v40 = vmul.f32 0.03125, %v785_v38 }
 0x146   : > { %v794_v41 = vadd.f32 1e-05, %v790_v39  ;;  %v795_v42 = vadd.f32 1e-05, %v791_v40 }
 0x147   : > { %v788_v43 = vpop.xlane.xlu1 %787 }
 0x148   : > { %5253 = vrsqrt.f32 %v794_v41  ;;  %v792_v44 = vmul.f32 0.03125, %v788_v43 }
 0x149   : > { %5255 = vrsqrt.f32 %v795_v42 }
 0x14a   : > { %v796_v45 = vadd.f32 1e-05, %v792_v44 }
 0x14c   : > { %5257 = vrsqrt.f32 %v796_v45 }
 0x151   : > { %v5252_v46 = vpop.eup %5251 }
 0x152   : > { %v801_v48 = vmul.f32 %v5252_v46, %v769_v18 }
 0x154   : > { %v811_v50 = vmul.f32 %v4930_v47, %v801_v48 }
 0x155   : > { %v5254_v51 = vpop.eup %5253 }
 0x156   : > { %v5256_v52 = vpop.eup %5255  ;;  %v821_v53 = vadd.f32 %v4931_v49, %v811_v50  ;;  %v802_v54 = vmul.f32 %v5254_v51, %v770_v26 }
 0x157   : > { %v803_v55 = vmul.f32 %v5256_v52, %v771_v19 }
 0x158   : > { %825 = vst.msk [vmem:[#allocation2] sm:$0xff] %vm751_vm0, %v821_v53  ;;  %v812_v56 = vmul.f32 %v4930_v47, %v802_v54 }
 0x159   : > { %v5258_v57 = vpop.eup %5257  ;;  %v813_v58 = vmul.f32 %v4930_v47, %v803_v55 }
 0x15a   : > { %v822_v59 = vadd.f32 %v4931_v49, %v812_v56  ;;  %v804_v60 = vmul.f32 %v5258_v57, %v772_v27 }
 0x15b   : > { %v823_v61 = vadd.f32 %v4931_v49, %v813_v58 }
 0x15c   : > { %826 = vst.msk [vmem:[#allocation2 + $0x8] sm:$0xff] %vm751_vm0, %v822_v59  ;;  %v814_v62 = vmul.f32 %v4930_v47, %v804_v60 }
 0x15d   : > { %827 = vst.msk [vmem:[#allocation2 + $0x10] sm:$0xff] %vm751_vm0, %v823_v61 }
 0x15e   : > { %v824_v63 = vadd.f32 %v4931_v49, %v814_v62 }
 0x160   : > { %828 = vst.msk [vmem:[#allocation2 + $0x18] sm:$0xff] %vm751_vm0, %v824_v63 }
 0x161 PF: > { %v829_v0 = vld [vmem:[#allocation2] sm:$0xff]  ;;  %vm835_vm1 = vcmask 261120   ;;  %v5289_v28 = vld [vmem:[%s5564_s24 + $0x8] sm:$0xff]   ;;  %s6809_s28 = sld [smem:[#allocation13_spill]]  ;;  %s6813_s4 = scalar_lea.vmem %s6771_s7, %s5546_s25  ;;  %vm5435_vm2 = vmmov 0   ;;  %vm2773_vm3 = vcmask 64512  }
 0x162   : > { %v836_v3 = vsel %vm835_vm1, %v829_v0, 0.0  ;;  %v5290_v29 = vld [vmem:[%s5564_s24] sm:$0xff]   ;;  %5075 = vmatprep.subr.bf16.mxu0 %v5289_v28  ;;  %s6811_s17 = sld [smem:[#allocation14_spill]]  ;;  %s5427_s24 = smov 120   ;;  %vm3171_vm5 = vcmask 130048   ;;  %vm4316_vm6 = vcmask 195584  }
 0x163   : > { %v830_v2 = vld [vmem:[#allocation2 + $0x8] sm:$0xff]  ;;  %837 = vadd.xlane.f32.xlu0 %v836_v3  ;;  %5076 = vmatpush3.bf16.msra.mxu0 %v5289_v28  ;;  %v4934_v62 = vld [vmem:[%s6813_s4] ss:$0 sm:$0xff]  ;;  %s5428_s16 = smov 112   ;;  %s5433_s30 = smov 64  }
 0x164   : > { %v831_v1 = vld [vmem:[#allocation2 + $0x10] sm:$0xff]  ;;  %v839_v6 = vsel %vm835_vm1, %v830_v2, 0.0  ;;  %5077 = vmatprep.subr.bf16.mxu0 %v5290_v29  ;;  %s6831_s19 = sld [smem:[#allocation6_spill]]  ;;  %s5438_s22 = smov 24  }
 0x165   : > { %v842_v4 = vsel %vm835_vm1, %v831_v1, 0.0  ;;  %p5012_p6 = scmp.ne.s32.totalorder %s5417_s21, 1 }
 0x166   : > { %843 = vadd.xlane.f32.xlu1 %v842_v4 }
 0x167   : > { %v832_v5 = vld [vmem:[#allocation2 + $0x18] sm:$0xff]  ;;  %840 = vadd.xlane.f32.xlu0 %v839_v6  ;;  %5078 = vmatpush3.bf16.msra.mxu0 %v5290_v29  ;;  %s6810_s0 = scalar_lea.vmem %s6809_s28, %s5546_s25  ;;  %s5429_s28 = smov 104  }
 0x168   : > { %v845_v7 = vsel %vm835_vm1, %v832_v5, 0.0  ;;  %v4932_v44 = vld [vmem:[%s6810_s0] ss:$0 sm:$0xff]  ;;  %s6812_s27 = scalar_lea.vmem %s6811_s17, %s5546_s25  ;;  %s5430_s0 = smov 96  }
 0x169   : > { %v4933_v49 = vld [vmem:[%s6812_s27] ss:$0 sm:$0xff]  ;;  %s5436_s17 = smov 16   ;;  %s5437_s27 = smov 8  }
 0x16a   : > { %846 = vadd.xlane.f32.xlu1 %v845_v7  ;;  %v5431_v7 = vmov 1983009808  }
 0x1ec   : > { %v838_v8 = vpop.xlane.xlu0 %837 }
 0x1ed   : > { %v849_v10 = vmul.f32 0.03125, %v838_v8  ;;  %v1032_v8 = vunpack.c.l.s4 %v5431_v7 }
 0x1ef   : > { %v844_v9 = vpop.xlane.xlu1 %843  ;;  %v853_v12 = vsub.f32 %v829_v0, %v849_v10 }
 0x1f0   : > { %v851_v11 = vmul.f32 0.03125, %v844_v9  ;;  %v841_v14 = vpop.xlane.xlu0 %840  ;;  %v6786_v9 = vlaneseq }
 0x1f1   : > { %v850_v16 = vmul.f32 0.03125, %v841_v14  ;;  %v857_v18 = vmul.f32 %v853_v12, %v853_v12  ;;  %v1033_v14 = vunpack.c.0.s8 %v1032_v8 }
 0x1f2   : > { %v855_v13 = vsub.f32 %v831_v1, %v851_v11 }
 0x1f3   : > { %v847_v15 = vpop.xlane.xlu1 %846  ;;  %v854_v20 = vsub.f32 %v830_v2, %v850_v16  ;;  %v861_v22 = vsel %vm835_vm1, %v857_v18, 0.0 }
 0x1f4   : > { %v852_v17 = vmul.f32 0.03125, %v847_v15  ;;  %v859_v19 = vmul.f32 %v855_v13, %v855_v13  ;;  %862 = vadd.xlane.f32.xlu0 %v861_v22  ;;  %v1035_v15 = vshrl.u32 %v6786_v9, 7 }
 0x1f5   : > { %v858_v24 = vmul.f32 %v854_v20, %v854_v20 }
 0x1f6   : > { %v856_v21 = vsub.f32 %v832_v5, %v852_v17  ;;  %v867_v23 = vsel %vm835_vm1, %v859_v19, 0.0  ;;  %v5707_v19 = vsub.s32 %v1033_v14, %v1035_v15 }
 0x1f7   : > { %v864_v26 = vsel %vm835_vm1, %v858_v24, 0.0 }
 0x1f8   : > { %v860_v25 = vmul.f32 %v856_v21, %v856_v21  ;;  %868 = vadd.xlane.f32.xlu0 %v867_v23  ;;  %865 = vadd.xlane.f32.xlu1 %v864_v26 }
 0x1fa   : > { %v870_v27 = vsel %vm835_vm1, %v860_v25, 0.0 }
 0x1fc   : > { %871 = vadd.xlane.f32.xlu1 %v870_v27 }
 0x27d   : > { %v863_v30 = vpop.xlane.xlu0 %862 }
 0x27e   : > { %v873_v31 = vmul.f32 0.03125, %v863_v30 }
 0x280   : > { %v877_v32 = vadd.f32 1e-05, %v873_v31 }
 0x281   : > { %v866_v33 = vpop.xlane.xlu1 %865  ;;  %v869_v34 = vpop.xlane.xlu0 %868 }
 0x282   : > { %5303 = vrsqrt.f32 %v877_v32  ;;  %v874_v35 = vmul.f32 0.03125, %v866_v33  ;;  %v875_v36 = vmul.f32 0.03125, %v869_v34 }
 0x284   : > { %v878_v37 = vadd.f32 1e-05, %v874_v35  ;;  %v879_v38 = vadd.f32 1e-05, %v875_v36 }
 0x285   : > { %v872_v39 = vpop.xlane.xlu1 %871 }
 0x286   : > { %5305 = vrsqrt.f32 %v878_v37  ;;  %v876_v40 = vmul.f32 0.03125, %v872_v39 }
 0x287   : > { %5307 = vrsqrt.f32 %v879_v38 }
 0x288   : > { %v880_v41 = vadd.f32 1e-05, %v876_v40 }
 0x28a   : > { %5309 = vrsqrt.f32 %v880_v41 }
 0x28f   : > { %v5304_v42 = vpop.eup %5303 }
 0x290   : > { %v885_v43 = vmul.f32 %v5304_v42, %v853_v12  ;;  %v5432_v12 = vmov 1934713408  }
 0x292   : > { %v895_v48 = vmul.f32 %v4932_v44, %v885_v43 }
 0x293   : > { %v5306_v45 = vpop.eup %5305 }
 0x294   : > { %v5308_v46 = vpop.eup %5307  ;;  %v886_v47 = vmul.f32 %v5306_v45, %v854_v20  ;;  %v905_v53 = vadd.f32 %v4933_v49, %v895_v48 }
 0x295   : > { %v887_v50 = vmul.f32 %v5308_v46, %v855_v13  ;;  %v1064_v13 = vunpack.c.l.s4 %v5432_v12 }
 0x296   : > { %v896_v51 = vmul.f32 %v4932_v44, %v886_v47 }
 0x297   : > { %v5310_v52 = vpop.eup %5309  ;;  %v897_v56 = vmul.f32 %v4932_v44, %v887_v50  ;;  %v1065_v18 = vunpack.c.0.s8 %v1064_v13 }
 0x298   : > { %v906_v54 = vadd.f32 %v4933_v49, %v896_v51  ;;  %v888_v55 = vmul.f32 %v5310_v52, %v856_v21 }
 0x299   : > { %v907_v59 = vadd.f32 %v4933_v49, %v897_v56  ;;  %v5723_v25 = vsub.s32 %v1065_v18, %v1035_v15 }
 0x29a   : > { %v909_v57 = vpack.c.bf16 %v906_v54, %v905_v53  ;;  %v898_v58 = vmul.f32 %v4932_v44, %v888_v55 }
 0x29c   : > { %5079 = vmatprep.mubr.msk.bf16.mxu0 %vm835_vm1, %v909_v57  ;;  %v908_v60 = vadd.f32 %v4933_v49, %v898_v58 }
 0x29e   : > { %v910_v61 = vpack.c.bf16 %v908_v60, %v907_v59 }
 0x2a0   : > { %5080 = vmatmul.mubr.msk.bf16.vlgmr.msra.gmra.mxu0 %vm835_vm1, %v910_v61 }
 0x360   : > { %v5081_v63 = vpop.f32.mrf.mxu0 }
 0x361   : > { %v5666_v0 = vadd.f32 %v5081_v63, %v4934_v62 }
 0x362   : > { %v974_v1 = vpop.f32.mrf.mxu0 }
 0x363   : > { %v5668_v2 = vadd.f32 %v4934_v62, %v974_v1  ;;  %997 = vrot.lane.b32.xlu0 %v5666_v0, %s5427_s24 }
 0x364   : > { %v5082_v3 = vpop.f32.mrf.mxu0 }
 0x365   : > { %1005 = vrot.lane.b32.xlu1 %v5668_v2, %s5428_s16  ;;  %v5672_v4 = vadd.f32 %v5082_v3, %v4934_v62 }
 0x366   : > { %v977_v5 = vpop.f32.mrf.mxu0 }
 0x367   : > { %993 = vrot.lane.b32.xlu0 %v5668_v2, %s5427_s24  ;;  %v5676_v6 = vadd.f32 %v4934_v62, %v977_v5 }
 0x369   : > { %999 = vrot.lane.b32.xlu1 %v5672_v4, %s5427_s24 }
 0x36b   : > { %1017 = vrot.lane.b32.xlu0 %v5668_v2, %s5429_s28 }
 0x36d   : > { %995 = vrot.lane.b32.xlu1 %v5676_v6, %s5427_s24  ;;  %s6832_s24 = scalar_lea.vmem %s6773_s9, %s5546_s25 }
 0x36f   : > { %1009 = vrot.lane.b32.xlu0 %v5666_v0, %s5428_s16 }
 0x371   : > { %1007 = vrot.lane.b32.xlu1 %v5676_v6, %s5428_s16 }
 0x373   : > { %1021 = vrot.lane.b32.xlu0 %v5666_v0, %s5429_s28 }
 0x375   : > { %1019 = vrot.lane.b32.xlu1 %v5676_v6, %s5429_s28 }
 0x377   : > { %1573 = vrot.lane.b32.xlu0 %v5668_v2, %s5430_s0 }
 0x379   : > { %1011 = vrot.lane.b32.xlu1 %v5672_v4, %s5428_s16 }
 0x37b   : > { %1577 = vrot.lane.b32.xlu0 %v5666_v0, %s5430_s0 }
 0x37d   : > { %1023 = vrot.lane.b32.xlu1 %v5672_v4, %s5429_s28 }
 0x381   : > { %1579 = vrot.lane.b32.xlu1 %v5672_v4, %s5430_s0 }
 0x385   : > { %1575 = vrot.lane.b32.xlu1 %v5676_v6, %s5430_s0 }
 0x3d5   : > { %v5694_v10 = vpop.permute.xlu0 %997 }
 0x3d6   : > { %1585 = vrot.lane.b32.xlu0 %v5694_v10, %s5430_s0 }
 0x3d7   : > { %v5698_v11 = vpop.permute.xlu1 %1005 }
 0x3d8   : > { %v1029_v20 = vcombine.low %v5668_v2, %v5698_v11  ;;  %v1030_v21 = vcombine.high %v5668_v2, %v5698_v11 }
 0x3d9   : > { %v5701_v16 = vpop.permute.xlu0 %993 }
 0x3da   : > { %1581 = vrot.lane.b32.xlu0 %v5701_v16, %s5430_s0  ;;  %v1037_v27 = vrot.slane %v1029_v20, %v5707_v19  ;;  %v1044_v28 = vrot.slane %v1030_v21, %v5707_v19 }
 0x3db   : > { %v5705_v17 = vpop.permute.xlu1 %999 }
 0x3dc   : > { %1587 = vrot.lane.b32.xlu1 %v5705_v17, %s5430_s0 }
 0x3dd   : > { %v5715_v22 = vpop.permute.xlu0 %1017 }
 0x3de   : > { %v1045_v23 = vcombine.low %v5701_v16, %v5715_v22  ;;  %v1046_v24 = vcombine.high %v5701_v16, %v5715_v22  ;;  %1589 = vrot.lane.b32.xlu0 %v5698_v11, %s5430_s0 }
 0x3df   : > { %v5725_v26 = vpop.permute.xlu1 %995 }
 0x3e0   : > { %v1053_v29 = vrot.slane %v1045_v23, %v5707_v19  ;;  %v1060_v30 = vrot.slane %v1046_v24, %v5707_v19  ;;  %1583 = vrot.lane.b32.xlu1 %v5725_v26, %s5430_s0 }
 0x3e1   : > { %v5735_v35 = vpop.permute.xlu0 %1009 }
 0x3e2   : > { %v1061_v31 = vcombine.low %v1037_v27, %v1053_v29  ;;  %v1062_v32 = vcombine.high %v1037_v27, %v1053_v29  ;;  %v1077_v33 = vcombine.low %v1044_v28, %v1060_v30  ;;  %v1078_v34 = vcombine.high %v1044_v28, %v1060_v30  ;;  %1597 = vrot.lane.b32.xlu0 %v5715_v22, %s5430_s0 }
 0x3e3   : > { %6814 = vst [vmem:[#allocation7_spill] sm:$0xff] %v5735_v35  ;;  %v5737_v36 = vpop.permute.xlu1 %1007 }
 0x3e4   : > { %v1069_v37 = vrot.slane %v1061_v31, %v5723_v25  ;;  %v1076_v38 = vrot.slane %v1062_v32, %v5723_v25  ;;  %v1085_v39 = vrot.slane %v1077_v33, %v5723_v25  ;;  %v1092_v40 = vrot.slane %v1078_v34, %v5723_v25  ;;  %1591 = vrot.lane.b32.xlu1 %v5737_v36, %s5430_s0 }
 0x3e5   : > { %v1097_v45 = vcombine.low %v5676_v6, %v5737_v36  ;;  %v1098_v46 = vcombine.high %v5676_v6, %v5737_v36  ;;  %v5765_v52 = vpop.permute.xlu0 %1021  ;;  %v6787_v33 = vmov 0.0  }
 0x3e6   : > { %v1301_v41 = vcombine.low %v1069_v37, %v1076_v38  ;;  %v4939_v42 = vcombine.high %v1069_v37, %v1076_v38  ;;  %v1317_v43 = vcombine.low %v1085_v39, %v1092_v40  ;;  %v4940_v44 = vcombine.high %v1085_v39, %v1092_v40  ;;  %1593 = vrot.lane.b32.xlu0 %v5735_v35, %s5430_s0 }
 0x3e7   : > { %v5751_v47 = vpop.permute.xlu1 %1019  ;;  %6815 = vst [vmem:[#allocation8_spill] sm:$0xff] %v5765_v52  ;;  %v1105_v60 = vrot.slane %v1097_v45, %v5707_v19  ;;  %v1112_v61 = vrot.slane %v1098_v46, %v5707_v19  ;;  %5083 = vmatprep.subr.bf16.mxu0 %v6787_v33  ;;  %5095 = vmatprep.subr.bf16.mxu1 %v6787_v33 }
 0x3e8   : > { %v5754_v48 = vrot.slane %v1301_v41, %v5707_v19  ;;  %v1316_v49 = vrot.slane %v4939_v42, %v5707_v19  ;;  %v5758_v50 = vrot.slane %v1317_v43, %v5707_v19  ;;  %v5761_v51 = vrot.slane %v4940_v44, %v5707_v19  ;;  %1599 = vrot.lane.b32.xlu1 %v5751_v47, %s5430_s0 }
 0x3e9   : > { %v1113_v53 = vcombine.low %v5725_v26, %v5751_v47  ;;  %v1114_v54 = vcombine.high %v5725_v26, %v5751_v47  ;;  %5085 = vmatprep.mubr.msk.bf16.mxu0 %vm5435_vm2, %v6787_v33  ;;  %5097 = vmatprep.mubr.msk.bf16.mxu1 %vm5435_vm2, %v6787_v33 }
 0x3ea   : > { %v1333_v55 = vcombine.low %v5754_v48, %v1316_v49  ;;  %v1334_v56 = vcombine.high %v5754_v48, %v1316_v49  ;;  %v1349_v57 = vcombine.low %v5758_v50, %v5761_v51  ;;  %v1350_v58 = vcombine.high %v5758_v50, %v5761_v51  ;;  %1601 = vrot.lane.b32.xlu0 %v5765_v52, %s5430_s0 }
 0x3eb   : > { %v5779_v59 = vpop.permute.xlu1 %1011  ;;  %v1121_v62 = vrot.slane %v1113_v53, %v5707_v19  ;;  %v1128_v63 = vrot.slane %v1114_v54, %v5707_v19  ;;  %v1182_v54 = vcombine.high %v5694_v10, %v5765_v52 }
 0x3ec   : > { %6816 = vst [vmem:[#allocation9_spill] sm:$0xff] %v5779_v59  ;;  %1595 = vrot.lane.b32.xlu1 %v5779_v59, %s5430_s0  ;;  %v1357_v34 = vrot.slane %v1349_v57, %v5723_v25  ;;  %v1348_v42 = vrot.slane %v1334_v56, %v5723_v25  ;;  %v1364_v43 = vrot.slane %v1350_v58, %v5723_v25 }
 0x3ed   : > { %v1129_v1 = vcombine.low %v1105_v60, %v1121_v62  ;;  %v1130_v3 = vcombine.high %v1105_v60, %v1121_v62  ;;  %v1145_v5 = vcombine.low %v1112_v61, %v1128_v63  ;;  %v1146_v7 = vcombine.high %v1112_v61, %v1128_v63  ;;  %v5861_v63 = vpop.permute.xlu0 %1573 }
 0x3ee   : > { %2165 = vrot.lane.b32.xlu0 %v5668_v2, %s5433_s30  ;;  %v1367_v46 = vcombine.low %v1348_v42, %v1364_v43  ;;  %v1368_v49 = vcombine.high %v1348_v42, %v1364_v43  ;;  %v1166_v56 = vcombine.high %v5666_v0, %v5735_v35  ;;  %v1196_v58 = vrot.slane %v1182_v54, %v5707_v19 }
 0x3ef   : > { %v5789_v8 = vpop.permute.xlu1 %1023  ;;  %v1137_v12 = vrot.slane %v1129_v1, %v5723_v25  ;;  %v1144_v13 = vrot.slane %v1130_v3, %v5723_v25  ;;  %v1153_v14 = vrot.slane %v1145_v5, %v5723_v25  ;;  %v1160_v15 = vrot.slane %v1146_v7, %v5723_v25 }
 0x3f0   : > { %6817 = vst [vmem:[#allocation10_spill] sm:$0xff] %v5789_v8  ;;  %1603 = vrot.lane.b32.xlu1 %v5789_v8, %s5430_s0  ;;  %v1250_v57 = vcombine.high %v5705_v17, %v5789_v8  ;;  %v1233_v60 = vcombine.low %v5672_v4, %v5779_v59  ;;  %v1234_v61 = vcombine.high %v5672_v4, %v5779_v59 }
 0x3f1   : > { %v1369_v18 = vcombine.low %v1137_v12, %v1144_v13  ;;  %v4941_v20 = vcombine.high %v1137_v12, %v1144_v13  ;;  %v1385_v21 = vcombine.low %v1153_v14, %v1160_v15  ;;  %v4942_v23 = vcombine.high %v1153_v14, %v1160_v15 }
 0x3f2   : > { %2181 = vrot.lane.b32.xlu0 %v5698_v11, %s5433_s30  ;;  %v1341_v11 = vrot.slane %v1333_v55, %v5723_v25  ;;  %v1165_v55 = vcombine.low %v5666_v0, %v5735_v35  ;;  %v1264_v3 = vrot.slane %v1250_v57, %v5707_v19  ;;  %v1241_v14 = vrot.slane %v1233_v60, %v5707_v19 }
 0x3f3   : > { %v1376_v2 = vrot.slane %v1369_v18, %v5707_v19  ;;  %v1384_v24 = vrot.slane %v4941_v20, %v5707_v19  ;;  %v1392_v27 = vrot.slane %v1385_v21, %v5707_v19  ;;  %v1400_v28 = vrot.slane %v4942_v23, %v5707_v19 }
 0x3f4   : > { %2167 = vrot.lane.b32.xlu1 %v5676_v6, %s5433_s30  ;;  %v1366_v39 = vcombine.high %v1341_v11, %v1357_v34  ;;  %v1173_v62 = vrot.slane %v1165_v55, %v5707_v19  ;;  %v1248_v15 = vrot.slane %v1234_v61, %v5707_v19 }
 0x3f5   : > { %v1401_v29 = vcombine.low %v1376_v2, %v1384_v24  ;;  %v1402_v30 = vcombine.high %v1376_v2, %v1384_v24  ;;  %v1417_v31 = vcombine.low %v1392_v27, %v1400_v28  ;;  %v1418_v32 = vcombine.high %v1392_v27, %v1400_v28  ;;  %v5871_v28 = vpop.permute.xlu0 %1577 }
 0x3f6   : > { %2189 = vrot.lane.b32.xlu0 %v5715_v22, %s5433_s30  ;;  %v1365_v22 = vcombine.low %v1341_v11, %v1357_v34  ;;  %v1281_v20 = vcombine.low %v1248_v15, %v1264_v3  ;;  %v1282_v21 = vcombine.high %v1248_v15, %v1264_v3 }
 0x3f7   : > { %v1409_v37 = vrot.slane %v1401_v29, %v5723_v25  ;;  %v1425_v6 = vrot.slane %v1417_v31, %v5723_v25  ;;  %v1416_v44 = vrot.slane %v1402_v30, %v5723_v25  ;;  %v1432_v45 = vrot.slane %v1418_v32, %v5723_v25  ;;  %v5873_v29 = vpop.permute.xlu1 %1579 }
 0x3f8   : > { %2173 = vrot.lane.b32.xlu1 %v5701_v16, %s5433_s30  ;;  %v1289_v32 = vrot.slane %v1281_v20, %v5723_v25  ;;  %v1296_v11 = vrot.slane %v1282_v21, %v5723_v25 }
 0x3f9   : > { %v1433_v38 = vcombine.low %v1409_v37, %v1425_v6  ;;  %v1434_v40 = vcombine.high %v1409_v37, %v1425_v6  ;;  %v1435_v48 = vcombine.low %v1416_v44, %v1432_v45  ;;  %v1436_v50 = vcombine.high %v1416_v44, %v1432_v45 }
 0x3fa   : > { %2169 = vrot.lane.b32.xlu0 %v5666_v0, %s5433_s30  ;;  %v1180_v0 = vrot.slane %v1166_v56, %v5707_v19  ;;  %v1521_v42 = vcombine.low %v1289_v32, %v1296_v11  ;;  %v4946_v43 = vcombine.high %v1289_v32, %v1296_v11 }
 0x3fb   : > { %v5819_v16 = vpack.c.bf16 %v1433_v38, %v1365_v22  ;;  %v5821_v41 = vpack.c.bf16 %v1434_v40, %v1366_v39  ;;  %v5835_v51 = vpack.c.bf16 %v1435_v48, %v1367_v46  ;;  %v5837_v53 = vpack.c.bf16 %v1436_v50, %v1368_v49  ;;  %v1576_v44 = vpop.permute.xlu1 %1575 }
 0x3fc   : > { %2171 = vrot.lane.b32.xlu1 %v5672_v4, %s5433_s30  ;;  %v1213_v12 = vcombine.low %v1180_v0, %v1196_v58  ;;  %v1214_v13 = vcombine.high %v1180_v0, %v1196_v58  ;;  %v5900_v55 = vrot.slane %v1521_v42, %v5707_v19  ;;  %v5903_v56 = vrot.slane %v4946_v43, %v5707_v19 }
 0x3fe   : > { %v1221_v24 = vrot.slane %v1213_v12, %v5723_v25  ;;  %v1228_v27 = vrot.slane %v1214_v13, %v5723_v25  ;;  %v1553_v61 = vcombine.low %v5900_v55, %v5903_v56 }
 0x400   : > { %2175 = vrot.lane.b32.xlu1 %v5725_v26, %s5433_s30  ;;  %v1181_v26 = vcombine.low %v5694_v10, %v5765_v52  ;;  %v1453_v6 = vcombine.low %v1221_v24, %v1228_v27  ;;  %v4944_v22 = vcombine.high %v1221_v24, %v1228_v27  ;;  %v5932_v20 = vrot.slane %v1553_v61, %v5723_v25 }
 0x402   : > { %v5888_v48 = vrot.slane %v1453_v6, %v5707_v19  ;;  %v5891_v49 = vrot.slane %v4944_v22, %v5707_v19 }
 0x404   : > { %2183 = vrot.lane.b32.xlu1 %v5737_v36, %s5433_s30  ;;  %v1249_v36 = vcombine.low %v5705_v17, %v5789_v8 }
 0x406   : > { %v1257_v1 = vrot.slane %v1249_v36, %v5707_v19 }
 0x408   : > { %2191 = vrot.lane.b32.xlu1 %v5751_v47, %s5433_s30  ;;  %v1189_v47 = vrot.slane %v1181_v26, %v5707_v19  ;;  %v1265_v18 = vcombine.low %v1241_v14, %v1257_v1  ;;  %v1266_v4 = vcombine.high %v1241_v14, %v1257_v1 }
 0x40a   : > { %v1197_v5 = vcombine.low %v1173_v62, %v1189_v47  ;;  %v1198_v7 = vcombine.high %v1173_v62, %v1189_v47  ;;  %v1273_v30 = vrot.slane %v1265_v18, %v5723_v25  ;;  %v1280_v31 = vrot.slane %v1266_v4, %v5723_v25 }
 0x40b   : > { %v1485_v47 = vcombine.low %v5888_v48, %v5891_v49 }
 0x40c   : > { %v1205_v23 = vrot.slane %v1197_v5, %v5723_v25  ;;  %v1212_v2 = vrot.slane %v1198_v7, %v5723_v25  ;;  %v1505_v39 = vcombine.low %v1273_v30, %v1280_v31  ;;  %v4945_v40 = vcombine.high %v1273_v30, %v1280_v31 }
 0x40d   : > { %v5921_v7 = vrot.slane %v1485_v47, %v5723_v25 }
 0x40e   : > { %v1437_v34 = vcombine.low %v1205_v23, %v1212_v2  ;;  %v4943_v37 = vcombine.high %v1205_v23, %v1212_v2  ;;  %v5894_v26 = vrot.slane %v1505_v39, %v5707_v19  ;;  %v5897_v54 = vrot.slane %v4945_v40, %v5707_v19 }
 0x410   : > { %v5882_v45 = vrot.slane %v1437_v34, %v5707_v19  ;;  %v5885_v46 = vrot.slane %v4943_v37, %v5707_v19  ;;  %v1537_v60 = vcombine.low %v5894_v26, %v5897_v54 }
 0x412   : > { %v1469_v57 = vcombine.low %v5882_v45, %v5885_v46 }
 0x414   : > { %v5918_v5 = vrot.slane %v1469_v57, %v5723_v25 }
 0x416   : > { %v1501_v11 = vcombine.low %v5918_v5, %v5921_v7 }
 0x448   : > { %v5879_v38 = vpop.permute.xlu0 %1585 }
 0x44c   : > { %v1582_v50 = vpop.permute.xlu0 %1581 }
 0x44e   : > { %v5905_v36 = vpop.permute.xlu1 %1587 }
 0x450   : > { %v1590_v58 = vpop.permute.xlu0 %1589 }
 0x451   : > { %v1621_v62 = vcombine.low %v5861_v63, %v1590_v58  ;;  %v1622_v1 = vcombine.high %v5861_v63, %v1590_v58  ;;  %v5929_v63 = vrot.slane %v1537_v60, %v5723_v25 }
 0x452   : > { %v1584_v0 = vpop.permute.xlu1 %1583 }
 0x453   : > { %v1629_v18 = vrot.slane %v1621_v62, %v5707_v19  ;;  %v1636_v21 = vrot.slane %v1622_v1, %v5707_v19 }
 0x454   : > { %v1598_v3 = vpop.permute.xlu0 %1597 }
 0x455   : > { %v1637_v13 = vcombine.low %v1582_v50, %v1598_v3  ;;  %v1638_v14 = vcombine.high %v1582_v50, %v1598_v3  ;;  %v1569_v50 = vcombine.low %v5929_v63, %v5932_v20 }
 0x456   : > { %v1592_v4 = vpop.permute.xlu1 %1591 }
 0x457   : > { %v1645_v23 = vrot.slane %v1637_v13, %v5707_v19  ;;  %v1652_v2 = vrot.slane %v1638_v14, %v5707_v19  ;;  %v1689_v24 = vcombine.low %v1576_v44, %v1592_v4  ;;  %v1690_v31 = vcombine.high %v1576_v44, %v1592_v4 }
 0x458   : > { %v1594_v32 = vpop.permute.xlu0 %1593 }
 0x459   : > { %v1653_v34 = vcombine.low %v1629_v18, %v1645_v23  ;;  %v1654_v37 = vcombine.high %v1629_v18, %v1645_v23  ;;  %v1669_v6 = vcombine.low %v1636_v21, %v1652_v2  ;;  %v1670_v22 = vcombine.high %v1636_v21, %v1652_v2 }
 0x45a   : > { %v1697_v39 = vrot.slane %v1689_v24, %v5707_v19  ;;  %v1757_v40 = vcombine.low %v5871_v28, %v1594_v32  ;;  %v1758_v42 = vcombine.high %v5871_v28, %v1594_v32  ;;  %v1600_v43 = vpop.permute.xlu1 %1599  ;;  %v1704_v60 = vrot.slane %v1690_v31, %v5707_v19 }
 0x45b   : > { %v1661_v44 = vrot.slane %v1653_v34, %v5723_v25  ;;  %v1668_v57 = vrot.slane %v1654_v37, %v5723_v25  ;;  %v1677_v47 = vrot.slane %v1669_v6, %v5723_v25  ;;  %v1684_v58 = vrot.slane %v1670_v22, %v5723_v25 }
 0x45c   : > { %v1765_v61 = vrot.slane %v1757_v40, %v5707_v19  ;;  %v1705_v62 = vcombine.low %v1584_v0, %v1600_v43  ;;  %v1706_v1 = vcombine.high %v1584_v0, %v1600_v43  ;;  %v1602_v3 = vpop.permute.xlu0 %1601  ;;  %v1772_v18 = vrot.slane %v1758_v42, %v5707_v19 }
 0x45d   : > { %v1893_v28 = vcombine.low %v1661_v44, %v1668_v57  ;;  %v4947_v13 = vcombine.high %v1661_v44, %v1668_v57  ;;  %v1909_v14 = vcombine.low %v1677_v47, %v1684_v58  ;;  %v1773_v23 = vcombine.low %v5879_v38, %v1602_v3 }
 0x45e   : > { %v1713_v4 = vrot.slane %v1705_v62, %v5707_v19  ;;  %v1720_v21 = vrot.slane %v1706_v1, %v5707_v19  ;;  %v1774_v2 = vcombine.high %v5879_v38, %v1602_v3  ;;  %v1596_v24 = vpop.permute.xlu1 %1595  ;;  %v4948_v34 = vcombine.high %v1677_v47, %v1684_v58 }
 0x45f   : > { %v5960_v31 = vrot.slane %v1893_v28, %v5707_v19  ;;  %v5963_v0 = vrot.slane %v4947_v13, %v5707_v19  ;;  %v5966_v32 = vrot.slane %v1909_v14, %v5707_v19  ;;  %v1781_v43 = vrot.slane %v1773_v23, %v5707_v19 }
 0x460   : > { %v1721_v37 = vcombine.low %v1697_v39, %v1713_v4  ;;  %v1722_v6 = vcombine.high %v1697_v39, %v1713_v4  ;;  %v1737_v22 = vcombine.low %v1704_v60, %v1720_v21  ;;  %v1738_v40 = vcombine.high %v1704_v60, %v1720_v21  ;;  %v2166_v42 = vpop.permute.xlu0 %2165 }
 0x461   : > { %v1788_v38 = vrot.slane %v1774_v2, %v5707_v19  ;;  %v1825_v44 = vcombine.low %v5873_v29, %v1596_v24  ;;  %v1826_v57 = vcombine.high %v5873_v29, %v1596_v24  ;;  %v1789_v58 = vcombine.low %v1765_v61, %v1781_v43 }
 0x462   : > { %v1729_v62 = vrot.slane %v1721_v37, %v5723_v25  ;;  %v1736_v1 = vrot.slane %v1722_v6, %v5723_v25  ;;  %v1745_v3 = vrot.slane %v1737_v22, %v5723_v25  ;;  %v1752_v47 = vrot.slane %v1738_v40, %v5723_v25  ;;  %v1604_v39 = vpop.permute.xlu1 %1603 }
 0x463   : > { %v1790_v60 = vcombine.high %v1765_v61, %v1781_v43  ;;  %v1805_v28 = vcombine.low %v1772_v18, %v1788_v38  ;;  %v1806_v13 = vcombine.high %v1772_v18, %v1788_v38  ;;  %v1797_v29 = vrot.slane %v1789_v58, %v5723_v25 }
 0x464   : > { %v1961_v14 = vcombine.low %v1729_v62, %v1736_v1  ;;  %v4949_v4 = vcombine.high %v1729_v62, %v1736_v1  ;;  %v1977_v21 = vcombine.low %v1745_v3, %v1752_v47  ;;  %v4950_v23 = vcombine.high %v1745_v3, %v1752_v47  ;;  %v2182_v2 = vpop.permute.xlu0 %2181 }
 0x465   : > { %v1804_v24 = vrot.slane %v1790_v60, %v5723_v25  ;;  %v1813_v37 = vrot.slane %v1805_v28, %v5723_v25  ;;  %v1820_v6 = vrot.slane %v1806_v13, %v5723_v25  ;;  %v5981_v22 = vrot.slane %v4948_v34, %v5707_v19 }
 0x466   : > { %v5984_v61 = vrot.slane %v1961_v14, %v5707_v19  ;;  %v5987_v18 = vrot.slane %v4949_v4, %v5707_v19  ;;  %v5990_v40 = vrot.slane %v1977_v21, %v5707_v19  ;;  %v5992_v43 = vpop.permute.xlu1 %2167  ;;  %v5995_v38 = vrot.slane %v4950_v23, %v5707_v19 }
 0x467   : > { %v2029_v62 = vcombine.low %v1797_v29, %v1804_v24  ;;  %v4951_v1 = vcombine.high %v1797_v29, %v1804_v24  ;;  %v2045_v3 = vcombine.low %v1813_v37, %v1820_v6  ;;  %v4952_v47 = vcombine.high %v1813_v37, %v1820_v6 }
 0x468   : > { %v1833_v34 = vrot.slane %v1825_v44, %v5707_v19  ;;  %v1841_v58 = vcombine.low %v5905_v36, %v1604_v39  ;;  %v1842_v60 = vcombine.high %v5905_v36, %v1604_v39  ;;  %v1840_v4 = vrot.slane %v1826_v57, %v5707_v19  ;;  %v2190_v24 = vpop.permute.xlu0 %2189 }
 0x469   : > { %v6001_v28 = vrot.slane %v2029_v62, %v5707_v19  ;;  %v6004_v13 = vrot.slane %v4951_v1, %v5707_v19  ;;  %v6007_v14 = vrot.slane %v2045_v3, %v5707_v19  ;;  %v2213_v44 = vcombine.low %v2166_v42, %v2182_v2 }
 0x46a   : > { %v1849_v21 = vrot.slane %v1841_v58, %v5707_v19  ;;  %v1856_v23 = vrot.slane %v1842_v60, %v5707_v19  ;;  %v2214_v29 = vcombine.high %v2166_v42, %v2182_v2  ;;  %v2174_v37 = vpop.permute.xlu1 %2173  ;;  %v1925_v6 = vcombine.low %v5960_v31, %v5963_v0 }
 0x46b   : > { %v2229_v36 = vcombine.low %v2174_v37, %v2190_v24  ;;  %v2230_v39 = vcombine.high %v2174_v37, %v2190_v24  ;;  %v1941_v62 = vcombine.low %v5966_v32, %v5981_v22  ;;  %v2221_v58 = vrot.slane %v2213_v44, %v5707_v19 }
 0x46c   : > { %v1857_v1 = vcombine.low %v1833_v34, %v1849_v21  ;;  %v1858_v3 = vcombine.high %v1833_v34, %v1849_v21  ;;  %v1873_v9 = vcombine.low %v1840_v4, %v1856_v23  ;;  %v1874_v57 = vcombine.high %v1840_v4, %v1856_v23 }
 0x46d   : > { %v2228_v60 = vrot.slane %v2214_v29, %v5707_v19  ;;  %v2237_v42 = vrot.slane %v2229_v36, %v5707_v19  ;;  %v2244_v2 = vrot.slane %v2230_v39, %v5707_v19  ;;  %v1926_v52 = vcombine.high %v5960_v31, %v5963_v0 }
 0x46e   : > { %v1865_v24 = vrot.slane %v1857_v1, %v5723_v25  ;;  %v1872_v37 = vrot.slane %v1858_v3, %v5723_v25  ;;  %v1881_v15 = vrot.slane %v1873_v9, %v5723_v25  ;;  %v1888_v12 = vrot.slane %v1874_v57, %v5723_v25  ;;  %v6024_v30 = vpop.permute.xlu1 %2171 }
 0x46f   : > { %6818 = vst [vmem:[#allocation11_spill] sm:$0xff] %v6024_v30  ;;  %v2245_v34 = vcombine.low %v2221_v58, %v2237_v42  ;;  %v2246_v4 = vcombine.high %v2221_v58, %v2237_v42  ;;  %v2261_v21 = vcombine.low %v2228_v60, %v2244_v2  ;;  %v2262_v23 = vcombine.high %v2228_v60, %v2244_v2 }
 0x470   : > { %v2097_v44 = vcombine.low %v1865_v24, %v1872_v37  ;;  %v4953_v29 = vcombine.high %v1865_v24, %v1872_v37  ;;  %v2113_v27 = vcombine.low %v1881_v15, %v1888_v12  ;;  %v4954_v36 = vcombine.high %v1881_v15, %v1888_v12 }
 0x471   : > { %v2253_v39 = vrot.slane %v2245_v34, %v5723_v25  ;;  %v2260_v1 = vrot.slane %v2246_v4, %v5723_v25  ;;  %v2269_v3 = vrot.slane %v2261_v21, %v5723_v25  ;;  %v2276_v9 = vrot.slane %v2262_v23, %v5723_v25 }
 0x472   : > { %v6031_v57 = vrot.slane %v4952_v47, %v5707_v19  ;;  %v6034_v58 = vrot.slane %v2097_v44, %v5707_v19  ;;  %v6037_v60 = vrot.slane %v4953_v29, %v5707_v19  ;;  %v6040_v12 = vrot.slane %v2113_v27, %v5707_v19  ;;  %v6042_v15 = vpop.permute.xlu1 %2175 }
 0x473   : > { %v6045_v42 = vrot.slane %v4954_v36, %v5707_v19  ;;  %v2485_v2 = vcombine.low %v2253_v39, %v2260_v1  ;;  %v4955_v24 = vcombine.high %v2253_v39, %v2260_v1  ;;  %v2501_v37 = vcombine.low %v2269_v3, %v2276_v9 }
 0x474   : > { %v1933_v47 = vrot.slane %v1925_v6, %v5723_v25  ;;  %v1949_v34 = vrot.slane %v1941_v62, %v5723_v25  ;;  %v1993_v4 = vcombine.low %v5984_v61, %v5987_v18  ;;  %v2009_v21 = vcombine.low %v5990_v40, %v5995_v38 }
 0x475   : > { %v6054_v27 = vrot.slane %v2485_v2, %v5707_v19  ;;  %v4956_v23 = vcombine.high %v2269_v3, %v2276_v9  ;;  %v6062_v44 = vpack.c.bf16 %v1569_v50, %v1501_v11  ;;  %v6067_v62 = vrot.slane %v4955_v24, %v5707_v19 }
 0x476   : > { %v6070_v29 = vrot.slane %v2501_v37, %v5707_v19  ;;  %v2001_v36 = vrot.slane %v1993_v4, %v5723_v25  ;;  %v2017_v39 = vrot.slane %v2009_v21, %v5723_v25  ;;  %v2184_v1 = vpop.permute.xlu1 %2183  ;;  %v1957_v3 = vcombine.low %v1933_v47, %v1949_v34 }
 0x477   : > { %v1958_v9 = vcombine.high %v1933_v47, %v1949_v34  ;;  %v2061_v11 = vcombine.low %v6001_v28, %v6004_v13  ;;  %v2077_v50 = vcombine.low %v6007_v14, %v6031_v57  ;;  %v2129_v24 = vcombine.low %v6034_v58, %v6037_v60 }
 0x478   : > { %v2025_v2 = vcombine.low %v2001_v36, %v2017_v39  ;;  %v2026_v6 = vcombine.high %v2001_v36, %v2017_v39  ;;  %v2145_v37 = vcombine.low %v6040_v12, %v6045_v42  ;;  %v2281_v4 = vcombine.low %v5992_v43, %v2184_v1 }
 0x479   : > { %v2282_v21 = vcombine.high %v5992_v43, %v2184_v1  ;;  %v2069_v47 = vrot.slane %v2061_v11, %v5723_v25  ;;  %v2085_v34 = vrot.slane %v2077_v50, %v5723_v25  ;;  %v2137_v8 = vrot.slane %v2129_v24, %v5723_v25 }
 0x47a   : > { %v2765_v33 = vpack.c.bf16 %v2025_v2, %v1957_v3  ;;  %v2767_v30 = vpack.c.bf16 %v2026_v6, %v1958_v9  ;;  %v2153_v36 = vrot.slane %v2145_v37, %v5723_v25  ;;  %v1942_v35 = vcombine.high %v5966_v32, %v5981_v22  ;;  %v2192_v1 = vpop.permute.xlu1 %2191 }
 0x47b   : > { %v2093_v39 = vcombine.low %v2069_v47, %v2085_v34  ;;  %v1994_v43 = vcombine.high %v5984_v61, %v5987_v18  ;;  %v2010_v9 = vcombine.high %v5990_v40, %v5995_v38  ;;  %v1940_v50 = vrot.slane %v1926_v52, %v5723_v25 }
 0x47c   : > { %v2778_v11 = vsel %vm2773_vm3, %v2765_v33, 0  ;;  %v2872_v3 = vsel %vm2773_vm3, %v2767_v30, 0  ;;  %v2161_v6 = vcombine.low %v2137_v8, %v2153_v36  ;;  %v1956_v31 = vrot.slane %v1942_v35, %v5723_v25 }
 0x47d   : > { %5084 = vmatpush3.bf16.xpose.msra.mxu0 %v2778_v11  ;;  %5096 = vmatpush3.bf16.xpose.msra.mxu1 %v2872_v3  ;;  %v2008_v0 = vrot.slane %v1994_v43, %v5723_v25  ;;  %v6819_v32 = vmov 0.0   ;;  %v2024_v33 = vrot.slane %v2010_v9, %v5723_v25  ;;  %v2297_v30 = vcombine.low %v6042_v15, %v2192_v1 }
 0x47e   : > { %5089 = vmatprep.subr.bf16.mxu0 %v6819_v32  ;;  %5107 = vmatprep.subr.bf16.mxu1 %v6819_v32  ;;  %v2766_v22 = vpack.c.bf16 %v2161_v6, %v2093_v39  ;;  %v6106_v61 = vrot.slane %v4956_v23, %v5707_v19  ;;  %v2289_v18 = vrot.slane %v2281_v4, %v5707_v19 }
 0x47f   : > { %v2298_v52 = vcombine.high %v6042_v15, %v2192_v1  ;;  %v2162_v40 = vcombine.high %v2137_v8, %v2153_v36  ;;  %v2296_v35 = vrot.slane %v2282_v21, %v5707_v19  ;;  %v1959_v38 = vcombine.low %v1940_v50, %v1956_v31 }
 0x480   : > { %v2027_v2 = vcombine.low %v2008_v0, %v2024_v33  ;;  %v2305_v24 = vrot.slane %v2297_v30, %v5707_v19  ;;  %v2825_v37 = vsel %vm2773_vm3, %v2766_v22, 0  ;;  %v2094_v43 = vcombine.high %v2069_v47, %v2085_v34 }
 0x481   : > { %v2312_v39 = vrot.slane %v2298_v52, %v5707_v19  ;;  %v2028_v11 = vcombine.high %v2008_v0, %v2024_v33  ;;  %v1960_v9 = vcombine.high %v1940_v50, %v1956_v31  ;;  %v2062_v8 = vcombine.high %v6001_v28, %v6004_v13 }
 0x482   : > { %v2769_v3 = vpack.c.bf16 %v2027_v2, %v1959_v38  ;;  %v2313_v23 = vcombine.low %v2289_v18, %v2305_v24  ;;  %v2314_v6 = vcombine.high %v2289_v18, %v2305_v24  ;;  %v2768_v15 = vpack.c.bf16 %v2162_v40, %v2094_v43 }
 0x483   : > { %v2329_v4 = vcombine.low %v2296_v35, %v2312_v39  ;;  %v2330_v59 = vcombine.high %v2296_v35, %v2312_v39  ;;  %v2078_v36 = vcombine.high %v6007_v14, %v6031_v57  ;;  %v2771_v13 = vpack.c.bf16 %v2028_v11, %v1960_v9 }
 0x484   : > { %5086 = vmatmul.mubr.msk.bf16.vlgmr.msra.gmra.mxu0 %vm2773_vm3, %v5819_v16  ;;  %5098 = vmatmul.mubr.msk.bf16.vlgmr.msra.gmra.mxu1 %vm2773_vm3, %v5821_v41  ;;  %v2966_v21 = vsel %vm2773_vm3, %v2769_v3, 0  ;;  %v2321_v47 = vrot.slane %v2313_v23, %v5723_v25  ;;  %v2328_v34 = vrot.slane %v2314_v6, %v5723_v25  ;;  %v2130_v41 = vcombine.high %v6034_v58, %v6037_v60 }
 0x485   : > { %5090 = vmatpush3.bf16.xpose.msra.mxu0 %v2825_v37  ;;  %5108 = vmatpush3.bf16.xpose.msra.mxu1 %v2966_v21  ;;  %v2337_v1 = vrot.slane %v2329_v4, %v5723_v25  ;;  %v2344_v28 = vrot.slane %v2330_v59, %v5723_v25  ;;  %v6136_v59 = vrot.slane %v2062_v8, %v5723_v25  ;;  %v2919_v37 = vsel %vm2773_vm3, %v2768_v15, 0 }
 0x486   : > { %v2553_v16 = vcombine.low %v2321_v47, %v2328_v34  ;;  %v4957_v50 = vcombine.high %v2321_v47, %v2328_v34  ;;  %5091 = vmatprep.mubr.msk.bf16.mxu0 %vm5435_vm2, %v6819_v32  ;;  %5109 = vmatprep.mubr.msk.bf16.mxu1 %vm5435_vm2, %v6819_v32  ;;  %v6141_v22 = vrot.slane %v2130_v41, %v5723_v25  ;;  %v3060_v39 = vsel %vm2773_vm3, %v2771_v13, 0 }
 0x487   : > { %v2569_v31 = vcombine.low %v2337_v1, %v2344_v28  ;;  %v4958_v14 = vcombine.high %v2337_v1, %v2344_v28  ;;  %5101 = vmatprep.subr.bf16.mxu0 %v6819_v32  ;;  %5119 = vmatprep.subr.bf16.mxu1 %v6819_v32  ;;  %v2146_v33 = vcombine.high %v6040_v12, %v6045_v42 }
 0x488   : > { %v2560_v57 = vrot.slane %v2553_v16, %v5707_v19  ;;  %v2568_v0 = vrot.slane %v4957_v50, %v5707_v19  ;;  %v2517_v30 = vcombine.low %v6054_v27, %v6067_v62  ;;  %v2533_v18 = vcombine.low %v6070_v29, %v6106_v61 }
 0x489   : > { %v2576_v58 = vrot.slane %v2569_v31, %v5707_v19  ;;  %v2584_v60 = vrot.slane %v4958_v14, %v5707_v19  ;;  %v2092_v52 = vrot.slane %v2078_v36, %v5723_v25  ;;  %v2160_v40 = vrot.slane %v2146_v33, %v5723_v25 }
 0x48a   : > { %v2585_v35 = vcombine.low %v2560_v57, %v2568_v0  ;;  %v2518_v38 = vcombine.high %v6054_v27, %v6067_v62  ;;  %v2525_v12 = vrot.slane %v2517_v30, %v5723_v25  ;;  %v2541_v42 = vrot.slane %v2533_v18, %v5723_v25 }
 0x48b   : > { %v2601_v2 = vcombine.low %v2576_v58, %v2584_v60  ;;  %v2534_v24 = vcombine.high %v6070_v29, %v6106_v61  ;;  %v2163_v27 = vcombine.low %v6141_v22, %v2160_v40  ;;  %v6820_v29 = vcombine.high %v5894_v26, %v5897_v54 }
 0x48c   : > { %5092 = vmatmul.mubr.msk.bf16.vlgmr.msra.gmra.mxu0 %vm2773_vm3, %v6062_v44  ;;  %5110 = vmatmul.mubr.msk.bf16.vlgmr.msra.gmra.mxu1 %vm2773_vm3, %v5835_v51  ;;  %v2593_v62 = vrot.slane %v2585_v35, %v5723_v25  ;;  %v2550_v43 = vcombine.high %v2525_v12, %v2541_v42  ;;  %v1570_v51 = vcombine.high %v5929_v63, %v5932_v20 }
 0x48d   : > { %5102 = vmatpush3.bf16.xpose.msra.mxu0 %v2919_v37  ;;  %5120 = vmatpush3.bf16.xpose.msra.mxu1 %v3060_v39  ;;  %v1552_v61 = vrot.slane %v6820_v29, %v5723_v25  ;;  %v2609_v44 = vrot.slane %v2601_v2, %v5723_v25  ;;  %v2095_v11 = vcombine.low %v6136_v59, %v2092_v52 }
 0x48e   : > { %5103 = vmatprep.mubr.msk.bf16.mxu0 %vm5435_vm2, %v6819_v32  ;;  %5121 = vmatprep.mubr.msk.bf16.mxu1 %vm5435_vm2, %v6819_v32  ;;  %v2532_v3 = vrot.slane %v2518_v38, %v5723_v25  ;;  %v2548_v23 = vrot.slane %v2534_v24, %v5723_v25  ;;  %v2549_v9 = vcombine.low %v2525_v12, %v2541_v42 }
 0x48f   : > { %5113 = vmatprep.subr.bf16.mxu0 %v6819_v32  ;;  %5131 = vmatprep.subr.bf16.mxu1 %v6819_v32  ;;  %v2617_v26 = vcombine.low %v2593_v62, %v2609_v44  ;;  %v2618_v54 = vcombine.high %v2593_v62, %v2609_v44  ;;  %v2770_v6 = vpack.c.bf16 %v2163_v27, %v2095_v11 }
 0x490   : > { %v2586_v4 = vcombine.high %v2560_v57, %v2568_v0  ;;  %v2602_v15 = vcombine.high %v2576_v58, %v2584_v60  ;;  %v6821_v63 = vcombine.high %v5900_v55, %v5903_v56  ;;  %v2551_v21 = vcombine.low %v2532_v3, %v2548_v23 }
 0x491   : > { %v6187_v8 = vpack.c.bf16 %v2618_v54, %v2550_v43  ;;  %v2552_v47 = vcombine.high %v2532_v3, %v2548_v23  ;;  %v6822_v34 = vcombine.high %v5918_v5, %v5921_v7  ;;  %v3356_v1 = vpack.c.bf16 %v2617_v26, %v2549_v9 }
 0x492   : > { %v1568_v20 = vrot.slane %v6821_v63, %v5723_v25  ;;  %v2600_v28 = vrot.slane %v2586_v4, %v5723_v25  ;;  %v2616_v13 = vrot.slane %v2602_v15, %v5723_v25  ;;  %v6823_v16 = vcombine.high %v5882_v45, %v5885_v46 }
 0x493   : > { %v2760_v36 = vpack.c.bf16 %v1570_v51, %v6822_v34  ;;  %v6824_v55 = vcombine.high %v5888_v48, %v5891_v49  ;;  %v3013_v5 = vsel %vm2773_vm3, %v2770_v6, 0  ;;  %v2164_v7 = vcombine.high %v6141_v22, %v2160_v40 }
 0x494   : > { %v1484_v50 = vrot.slane %v6823_v16, %v5723_v25  ;;  %5122 = vmatmul.mubr.msk.bf16.vlgmr.msra.gmra.mxu1 %vm2773_vm3, %v5837_v53  ;;  %v2619_v41 = vcombine.low %v2600_v28, %v2616_v13  ;;  %v2620_v31 = vcombine.high %v2600_v28, %v2616_v13  ;;  %v1571_v45 = vcombine.low %v1552_v61, %v1568_v20 }
 0x495   : > { %v1500_v56 = vrot.slane %v6824_v55, %v5723_v25  ;;  %5104 = vmatmul.mubr.msk.bf16.vlgmr.msra.gmra.mxu0 %vm2773_vm3, %v2760_v36  ;;  %5132 = vmatpush3.bf16.msra.mxu1 %v3356_v1  ;;  %v2096_v46 = vcombine.high %v6136_v59, %v2092_v52  ;;  %v1572_v59 = vcombine.high %v1552_v61, %v1568_v20  ;;  %v6825_v58 = vlaneseq }
 0x496   : > { %5114 = vmatpush3.bf16.xpose.msra.mxu0 %v3013_v5  ;;  %5115 = vmatprep.mubr.msk.bf16.mxu0 %vm5435_vm2, %v6819_v32  ;;  %v6211_v48 = vpack.c.bf16 %v2619_v41, %v2551_v21  ;;  %v6213_v49 = vpack.c.bf16 %v2620_v31, %v2552_v47 }
 0x497   : > { %5125 = vmatprep.subr.bf16.mxu0 %v6819_v32  ;;  %5133 = vmatprep.mubr.msk.bf16.mxu1 %vm5435_vm2, %v6819_v32  ;;  %v1503_v53 = vcombine.low %v1484_v50, %v1500_v56  ;;  %v2772_v14 = vpack.c.bf16 %v2164_v7, %v2096_v46  ;;  %v1504_v22 = vcombine.high %v1484_v50, %v1500_v56  ;;  %v6227_v60 = vand.u32 127, %v6825_v58 }
 0x498   : > { %5143 = vmatprep.subr.bf16.mxu1 %v6819_v32 }
 0x499   : > { %v2762_v57 = vpack.c.bf16 %v1571_v45, %v1503_v53  ;;  %v3107_v0 = vsel %vm2773_vm3, %v2772_v14, 0  ;;  %v2764_v33 = vpack.c.bf16 %v1572_v59, %v1504_v22  ;;  %vm3152_vm4 = vcmp.lt.s32.totalorder %v6227_v60, 5  ;;  %v6336_v60 = vpop.permute.xlu0 %2169 }
 0x49d   : > { %5116 = vmatmul.mubr.msk.bf16.vlgmr.msra.gmra.mxu0 %vm2773_vm3, %v2762_v57 }
 0x49e   : > { %5126 = vmatpush3.bf16.xpose.msra.mxu0 %v3107_v0  ;;  %5127 = vmatprep.mubr.msk.bf16.mxu0 %vm5435_vm2, %v6819_v32 }
 0x49f   : > { %5137 = vmatprep.subr.bf16.mxu0 %v6819_v32 }
 0x4a5   : > { %5128 = vmatmul.mubr.msk.bf16.vlgmr.msra.gmra.mxu0 %vm2773_vm3, %v2764_v33 }
 0x4a6   : > { %5139 = vmatprep.mubr.msk.bf16.mxu0 %vm5435_vm2, %v6819_v32 }
 0x544   : > { %v2814_v30 = vpop.f32.mrf.mxu0  ;;  %v2908_v18 = vpop.f32.mrf.mxu1 }
 0x545   : > { %v6232_v52 = vsel %vm3152_vm4, %v2814_v30, -1e+30  ;;  %v6238_v12 = vsel %vm3152_vm4, %v2908_v18, -1e+30 }
 0x546   : > { %v5087_v40 = vpop.f32.mrf.mxu0  ;;  %v5099_v35 = vpop.f32.mrf.mxu1  ;;  %v3172_v38 = vsel %vm3171_vm5, %v6232_v52, -inf  ;;  %v3184_v27 = vsel %vm3171_vm5, %v6238_v12, -inf }
 0x547   : > { %3173 = vmax.xlane.f32.xlu0 %v3172_v38 }
 0x548   : > { %v2817_v42 = vpop.f32.mrf.mxu0  ;;  %v2911_v2 = vpop.f32.mrf.mxu1 }
 0x549   : > { %v6242_v24 = vsel %vm3152_vm4, %v2817_v42, -1e+30  ;;  %v6250_v29 = vsel %vm3152_vm4, %v2911_v2, -1e+30 }
 0x54a   : > { %v5088_v37 = vpop.f32.mrf.mxu0  ;;  %v5100_v39 = vpop.f32.mrf.mxu1  ;;  %v3175_v62 = vsel %vm3171_vm5, %v6242_v24, -inf  ;;  %v3187_v3 = vsel %vm3171_vm5, %v6250_v29, -inf }
 0x54b   : > { %3185 = vmax.xlane.f32.xlu0 %v3184_v27  ;;  %3176 = vmax.xlane.f32.xlu1 %v3175_v62  ;;  %v6826_v37 = vld [vmem:[#allocation9_spill] sm:$0xff]  ;;  %v6827_v39 = vld [vmem:[#allocation7_spill] sm:$0xff]  ;;  %v6828_v27 = vld [vmem:[#allocation8_spill] sm:$0xff] }
 0x54c   : > { %v2861_v61 = vpop.f32.mrf.mxu0  ;;  %v3002_v44 = vpop.f32.mrf.mxu1 }
 0x54d   : > { %v6254_v43 = vsel %vm3152_vm4, %v2861_v61, -1e+30  ;;  %v6262_v54 = vsel %vm3152_vm4, %v3002_v44, -1e+30 }
 0x54e   : > { %v5093_v51 = vpop.f32.mrf.mxu0  ;;  %v5111_v11 = vpop.f32.mrf.mxu1  ;;  %v3178_v26 = vsel %vm3171_vm5, %v6254_v43, -inf  ;;  %v3196_v20 = vsel %vm3171_vm5, %v6262_v54, -inf }
 0x54f   : > { %3188 = vmax.xlane.f32.xlu1 %v3187_v3  ;;  %3179 = vmax.xlane.f32.xlu0 %v3178_v26 }
 0x550   : > { %v2864_v23 = vpop.f32.mrf.mxu0  ;;  %v3005_v6 = vpop.f32.mrf.mxu1 }
 0x551   : > { %v6266_v9 = vsel %vm3152_vm4, %v3005_v6, -1e+30  ;;  %v6274_v21 = vsel %vm3152_vm4, %v2864_v23, -1e+30 }
 0x552   : > { %v5094_v4 = vpop.f32.mrf.mxu0  ;;  %v5112_v15 = vpop.f32.mrf.mxu1  ;;  %v3199_v63 = vsel %vm3171_vm5, %v6266_v9, -inf  ;;  %v3181_v28 = vsel %vm3171_vm5, %v6274_v21, -inf }
 0x553   : > { %3200 = vmax.xlane.f32.xlu1 %v3199_v63  ;;  %3197 = vmax.xlane.f32.xlu0 %v3196_v20 }
 0x554   : > { %v3096_v34 = vpop.f32.mrf.mxu1 }
 0x555   : > { %v2955_v47 = vpop.f32.mrf.mxu0  ;;  %v6292_v31 = vsel %vm3152_vm4, %v3096_v34, -1e+30 }
 0x556   : > { %v5123_v1 = vpop.f32.mrf.mxu1  ;;  %v6280_v13 = vsel %vm3152_vm4, %v2955_v47, -1e+30  ;;  %v3208_v14 = vsel %vm3171_vm5, %v6292_v31, -inf }
 0x557   : > { %v5105_v36 = vpop.f32.mrf.mxu0  ;;  %3182 = vmax.xlane.f32.xlu0 %v3181_v28  ;;  %v3190_v7 = vsel %vm3171_vm5, %v6280_v13, -inf }
 0x558   : > { %v3099_v50 = vpop.f32.mrf.mxu1 }
 0x559   : > { %v2958_v16 = vpop.f32.mrf.mxu0  ;;  %v6296_v45 = vsel %vm3152_vm4, %v3099_v50, -1e+30 }
 0x55a   : > { %v6284_v55 = vsel %vm3152_vm4, %v2958_v16, -1e+30  ;;  %v5124_v5 = vpop.f32.mrf.mxu1  ;;  %v3211_v57 = vsel %vm3171_vm5, %v6296_v45, -inf }
 0x55b   : > { %v5106_v56 = vpop.f32.mrf.mxu0  ;;  %v3193_v41 = vsel %vm3171_vm5, %v6284_v55, -inf  ;;  %3191 = vmax.xlane.f32.xlu0 %v3190_v7 }
 0x55c   : > { %3194 = vmax.xlane.f32.xlu1 %v3193_v41 }
 0x55d   : > { %v3049_v46 = vpop.f32.mrf.mxu0 }
 0x55e   : > { %v6304_v0 = vsel %vm3152_vm4, %v3049_v46, -1e+30 }
 0x55f   : > { %v5117_v53 = vpop.f32.mrf.mxu0  ;;  %3209 = vmax.xlane.f32.xlu0 %v3208_v14  ;;  %v3202_v33 = vsel %vm3171_vm5, %v6304_v0, -inf }
 0x560   : > { %3212 = vmax.xlane.f32.xlu1 %v3211_v57 }
 0x561   : > { %v3052_v59 = vpop.f32.mrf.mxu0 }
 0x562   : > { %v6314_v35 = vsel %vm3152_vm4, %v3052_v59, -1e+30 }
 0x563   : > { %v5118_v22 = vpop.f32.mrf.mxu0  ;;  %3203 = vmax.xlane.f32.xlu0 %v3202_v33  ;;  %v3205_v38 = vsel %vm3171_vm5, %v6314_v35, -inf }
 0x565   : > { %v3143_v58 = vpop.f32.mrf.mxu0 }
 0x566   : > { %v6320_v42 = vsel %vm3152_vm4, %v3143_v58, -1e+30 }
 0x567   : > { %v5129_v30 = vpop.f32.mrf.mxu0 }
 0x569   : > { %v3146_v18 = vpop.f32.mrf.mxu0 }
 0x56a   : > { %v6324_v2 = vsel %vm3152_vm4, %v3146_v18, -1e+30 }
 0x56b   : > { %v5130_v40 = vpop.f32.mrf.mxu0 }
 0x571   : > { %2179 = vrot.lane.b32.xlu1 %v5705_v17, %s5433_s30  ;;  %v3214_v17 = vsel %vm3171_vm5, %v6320_v42, -inf }
 0x579   : > { %2177 = vrot.lane.b32.xlu0 %v5694_v10, %s5433_s30  ;;  %v3217_v10 = vsel %vm3171_vm5, %v6324_v2, -inf }
 0x595   : > { %3206 = vmax.xlane.f32.xlu1 %v3205_v38 }
 0x598   : > { %3215 = vmax.xlane.f32.xlu0 %v3214_v17 }
 0x599   : > { %3218 = vmax.xlane.f32.xlu1 %v3217_v10 }
 0x5aa   : > { %2187 = vrot.lane.b32.xlu1 %v6826_v37, %s5433_s30 }
 0x5ae   : > { %2185 = vrot.lane.b32.xlu0 %v6827_v39, %s5433_s30 }
 0x5b2   : > { %2193 = vrot.lane.b32.xlu0 %v6828_v27, %s5433_s30 }
 0x5d0   : > { %v3174_v62 = vpop.xlane.xlu0 %3173 }
 0x5d1   : > { %v3220_v61 = vsub.f32 %v6232_v52, %v3174_v62  ;;  %v6829_v62 = vld [vmem:[#allocation10_spill] sm:$0xff] }
 0x5d3   : > { %v3236_v44 = vmul.f32 1.442695, %v3220_v61 }
 0x5d4   : > { %v3177_v51 = vpop.xlane.xlu1 %3176  ;;  %v3186_v11 = vpop.xlane.xlu0 %3185 }
 0x5d5   : > { %5311 = vpow2.f32 %v3236_v44  ;;  %v3221_v3 = vsub.f32 %v6242_v24, %v3177_v51  ;;  %v3224_v23 = vsub.f32 %v6238_v12, %v3186_v11 }
 0x5d7   : > { %v3238_v26 = vmul.f32 1.442695, %v3221_v3  ;;  %v3244_v20 = vmul.f32 1.442695, %v3224_v23 }
 0x5d8   : > { %v3180_v6 = vpop.xlane.xlu0 %3179  ;;  %v6342_v15 = vpop.xlane.xlu1 %3188 }
 0x5d9   : > { %5313 = vpow2.f32 %v3238_v26  ;;  %v3222_v4 = vsub.f32 %v6254_v43, %v3180_v6  ;;  %v3225_v44 = vsub.f32 %v6250_v29, %v6342_v15 }
 0x5db   : > { %v3240_v63 = vmul.f32 1.442695, %v3222_v4  ;;  %v3246_v11 = vmul.f32 1.442695, %v3225_v44 }
 0x5dc   : > { %v3198_v47 = vpop.xlane.xlu0 %3197  ;;  %v3201_v52 = vpop.xlane.xlu1 %3200 }
 0x5dd   : > { %5315 = vpow2.f32 %v3240_v63  ;;  %v3228_v7 = vsub.f32 %v6262_v54, %v3198_v47  ;;  %v3229_v3 = vsub.f32 %v6266_v9, %v3201_v52 }
 0x5de   : > { %5317 = vpow2.f32 %v3244_v20 }
 0x5df   : > { %v3252_v14 = vmul.f32 1.442695, %v3228_v7  ;;  %v3254_v26 = vmul.f32 1.442695, %v3229_v3 }
 0x5e0   : > { %v3183_v34 = vpop.xlane.xlu0 %3182 }
 0x5e1   : > { %v3223_v36 = vsub.f32 %v6274_v21, %v3183_v34 }
 0x5e2   : > { %v6345_v1 = vpop.eup %5311 }
 0x5e3   : > { %v3242_v24 = vmul.f32 1.442695, %v3223_v36  ;;  %v3268_v12 = vsel %vm3171_vm5, %v6345_v1, 0.0 }
 0x5e4   : > { %3269 = vadd.xlane.f32.xlu0 %v3268_v12  ;;  %v3192_v43 = vpop.xlane.xlu0 %3191 }
 0x5e5   : > { %v3195_v28 = vpop.xlane.xlu1 %3194  ;;  %5319 = vpow2.f32 %v3242_v24  ;;  %v3226_v50 = vsub.f32 %v6280_v13, %v3192_v43 }
 0x5e6   : > { %v3227_v16 = vsub.f32 %v6284_v55, %v3195_v28  ;;  %v6351_v56 = vpop.eup %5313 }
 0x5e7   : > { %v3248_v5 = vmul.f32 1.442695, %v3226_v50  ;;  %v3271_v21 = vsel %vm3171_vm5, %v6351_v56, 0.0 }
 0x5e8   : > { %v3250_v41 = vmul.f32 1.442695, %v3227_v16  ;;  %3272 = vadd.xlane.f32.xlu1 %v3271_v21  ;;  %v3210_v46 = vpop.xlane.xlu0 %3209 }
 0x5e9   : > { %5321 = vpow2.f32 %v3248_v5  ;;  %v3232_v54 = vsub.f32 %v6292_v31, %v3210_v46  ;;  %v3213_v51 = vpop.xlane.xlu1 %3212 }
 0x5ea   : > { %v6356_v53 = vpop.eup %5315  ;;  %5323 = vpow2.f32 %v3250_v41  ;;  %v3233_v6 = vsub.f32 %v6296_v45, %v3213_v51 }
 0x5eb   : > { %v3274_v55 = vsel %vm3171_vm5, %v6356_v53, 0.0  ;;  %v6360_v57 = vpop.eup %5317  ;;  %5325 = vpow2.f32 %v3252_v14  ;;  %v3260_v18 = vmul.f32 1.442695, %v3232_v54 }
 0x5ec   : > { %v3204_v13 = vpop.xlane.xlu0 %3203  ;;  %3275 = vadd.xlane.f32.xlu0 %v3274_v55  ;;  %v3280_v33 = vsel %vm3171_vm5, %v6360_v57, 0.0  ;;  %v3262_v34 = vmul.f32 1.442695, %v3233_v6 }
 0x5ed   : > { %v3230_v59 = vsub.f32 %v6304_v0, %v3204_v13  ;;  %v6395_v23 = vpop.permute.xlu1 %2179 }
 0x5ef   : > { %v3256_v22 = vmul.f32 1.442695, %v3230_v59 }
 0x5f0   : > { %3281 = vadd.xlane.f32.xlu0 %v3280_v33  ;;  %v2178_v4 = vpop.permute.xlu0 %2177 }
 0x5f1   : > { %5327 = vpow2.f32 %v3256_v22 }
 0x5f2   : > { %v6366_v58 = vpop.eup %5319  ;;  %5329 = vpow2.f32 %v3260_v18 }
 0x5f3   : > { %v3277_v30 = vsel %vm3171_vm5, %v6366_v58, 0.0  ;;  %5331 = vpow2.f32 %v3246_v11 }
 0x5f4   : > { %3278 = vadd.xlane.f32.xlu1 %v3277_v30  ;;  %5333 = vpow2.f32 %v3254_v26 }
 0x5f6   : > { %v6370_v40 = vpop.eup %5321 }
 0x5f7   : > { %v3286_v0 = vsel %vm3171_vm5, %v6370_v40, 0.0  ;;  %v6374_v31 = vpop.eup %5323 }
 0x5f8   : > { %3287 = vadd.xlane.f32.xlu0 %v3286_v0  ;;  %v3289_v38 = vsel %vm3171_vm5, %v6374_v31, 0.0  ;;  %v6378_v17 = vpop.eup %5325 }
 0x5f9   : > { %v3292_v10 = vsel %vm3171_vm5, %v6378_v17, 0.0 }
 0x5fc   : > { %3290 = vadd.xlane.f32.xlu0 %v3289_v38 }
 0x5fe   : > { %v6382_v37 = vpop.eup %5327 }
 0x5ff   : > { %v3298_v39 = vsel %vm3171_vm5, %v6382_v37, 0.0  ;;  %v6386_v27 = vpop.eup %5329 }
 0x600   : > { %3293 = vadd.xlane.f32.xlu0 %v3292_v10  ;;  %v3304_v61 = vsel %vm3171_vm5, %v6386_v27, 0.0  ;;  %v6401_v52 = vpop.eup %5331 }
 0x601   : > { %v3283_v45 = vsel %vm3171_vm5, %v6401_v52, 0.0  ;;  %v6405_v28 = vpop.eup %5333 }
 0x604   : > { %3299 = vadd.xlane.f32.xlu0 %v3298_v39 }
 0x605   : > { %2195 = vrot.lane.b32.xlu1 %v6829_v62, %s5433_s30  ;;  %s6833_s30 = sld [smem:[#allocation17_spill]] (!%p5012_p6) }
 0x608   : > { %3305 = vadd.xlane.f32.xlu0 %v3304_v61 }
 0x61e   : > { %v3207_v63 = vpop.xlane.xlu1 %3206 }
 0x61f   : > { %v3231_v20 = vsub.f32 %v6314_v35, %v3207_v63  ;;  %v3295_v35 = vsel %vm3171_vm5, %v6405_v28, 0.0 }
 0x621   : > { %v3258_v47 = vmul.f32 1.442695, %v3231_v20  ;;  %v3216_v24 = vpop.xlane.xlu0 %3215  ;;  %v6830_v20 = vld [vmem:[#allocation11_spill] sm:$0xff] }
 0x622   : > { %v3219_v36 = vpop.xlane.xlu1 %3218  ;;  %v3234_v9 = vsub.f32 %v6320_v42, %v3216_v24 }
 0x623   : > { %5335 = vpow2.f32 %v3258_v47  ;;  %v3235_v29 = vsub.f32 %v6324_v2, %v3219_v36 }
 0x624   : > { %v3264_v15 = vmul.f32 1.442695, %v3234_v9  ;;  %5337 = vpow2.f32 %v3262_v34 }
 0x625   : > { %v3266_v12 = vmul.f32 1.442695, %v3235_v29  ;;  %v2186_v41 = vpop.permute.xlu0 %2185 }
 0x626   : > { %5339 = vpow2.f32 %v3264_v15  ;;  %v2188_v14 = vpop.permute.xlu1 %2187  ;;  %v2349_v22 = vcombine.low %v6336_v60, %v2186_v41  ;;  %v2350_v33 = vcombine.high %v6336_v60, %v2186_v41 }
 0x627   : > { %5341 = vpow2.f32 %v3266_v12  ;;  %v2417_v47 = vcombine.low %v6830_v20, %v2188_v14  ;;  %v2418_v34 = vcombine.high %v6830_v20, %v2188_v14 }
 0x628   : > { %v2357_v0 = vrot.slane %v2349_v22, %v5707_v19  ;;  %v2364_v38 = vrot.slane %v2350_v33, %v5707_v19 }
 0x629   : > { %3284 = vadd.xlane.f32.xlu1 %v3283_v45  ;;  %v2194_v46 = vpop.permute.xlu0 %2193  ;;  %v2432_v41 = vrot.slane %v2418_v34, %v5707_v19 }
 0x62a   : > { %v2365_v13 = vcombine.low %v2178_v4, %v2194_v46  ;;  %v2366_v59 = vcombine.high %v2178_v4, %v2194_v46 }
 0x62c   : > { %v2373_v30 = vrot.slane %v2365_v13, %v5707_v19  ;;  %v2380_v18 = vrot.slane %v2366_v59, %v5707_v19 }
 0x62d   : > { %3296 = vadd.xlane.f32.xlu1 %v3295_v35 }
 0x62e   : > { %v2381_v10 = vcombine.low %v2357_v0, %v2373_v30  ;;  %v2382_v39 = vcombine.high %v2357_v0, %v2373_v30  ;;  %v2397_v61 = vcombine.low %v2364_v38, %v2380_v18  ;;  %v2398_v44 = vcombine.high %v2364_v38, %v2380_v18 }
 0x630   : > { %v6409_v2 = vpop.eup %5335  ;;  %v2389_v51 = vrot.slane %v2381_v10, %v5723_v25  ;;  %v2396_v11 = vrot.slane %v2382_v39, %v5723_v25  ;;  %v2405_v60 = vrot.slane %v2397_v61, %v5723_v25  ;;  %v2412_v26 = vrot.slane %v2398_v44, %v5723_v25 }
 0x631   : > { %v3301_v42 = vsel %vm3171_vm5, %v6409_v2, 0.0  ;;  %v6413_v43 = vpop.eup %5337 }
 0x632   : > { %3302 = vadd.xlane.f32.xlu1 %v3301_v42  ;;  %v3307_v50 = vsel %vm3171_vm5, %v6413_v43, 0.0  ;;  %v2621_v36 = vcombine.low %v2389_v51, %v2396_v11  ;;  %v4959_v9 = vcombine.high %v2389_v51, %v2396_v11  ;;  %v2637_v15 = vcombine.low %v2405_v60, %v2412_v26 }
 0x633   : > { %v6415_v16 = vpop.eup %5339  ;;  %v4960_v12 = vcombine.high %v2405_v60, %v2412_v26 }
 0x634   : > { %v3310_v5 = vsel %vm3171_vm5, %v6415_v16, 0.0  ;;  %v6421_v21 = vpop.eup %5341  ;;  %v6446_v46 = vrot.slane %v2621_v36, %v5707_v19  ;;  %v2636_v14 = vrot.slane %v4959_v9, %v5707_v19 }
 0x635   : > { %3311 = vadd.xlane.f32.xlu0 %v3310_v5  ;;  %v3313_v7 = vsel %vm3171_vm5, %v6421_v21, 0.0 }
 0x636   : > { %3308 = vadd.xlane.f32.xlu1 %v3307_v50 }
 0x63a   : > { %3314 = vadd.xlane.f32.xlu1 %v3313_v7  ;;  %v2425_v7 = vrot.slane %v2417_v47, %v5707_v19 }
 0x66d   : > { %v3270_v55 = vpop.xlane.xlu0 %3269 }
 0x66e   : > { %5343 = vrcp.f32 %v3270_v55  ;;  %v2652_v55 = vrot.slane %v4960_v12, %v5707_v19 }
 0x671   : > { %v3273_v54 = vpop.xlane.xlu1 %3272 }
 0x672   : > { %5345 = vrcp.f32 %v3273_v54 }
 0x675   : > { %v3276_v62 = vpop.xlane.xlu0 %3275 }
 0x679   : > { %v6435_v4 = vpop.xlane.xlu0 %3281 }
 0x67b   : > { %v5344_v3 = vpop.eup %5343 }
 0x67c   : > { %v3332_v24 = vmul.f32 %v5344_v3, %v6345_v1 }
 0x67d   : > { %v3279_v6 = vpop.xlane.xlu1 %3278 }
 0x67e   : > { %5347 = vrcp.f32 %v3279_v6 }
 0x67f   : > { %v5346_v63 = vpop.eup %5345  ;;  %5349 = vrcp.f32 %v3276_v62 }
 0x680   : > { %v3333_v29 = vmul.f32 %v5346_v63, %v6351_v56 }
 0x681   : > { %v2196_v45 = vpop.permute.xlu1 %2195  ;;  %v3288_v50 = vpop.xlane.xlu0 %3287 }
 0x682   : > { %v2433_v35 = vcombine.low %v6395_v23, %v2196_v45  ;;  %v2434_v42 = vcombine.high %v6395_v23, %v2196_v45  ;;  %v3348_v5 = vpack.c.bf16 %v3333_v29, %v3332_v24  ;;  %v2644_v23 = vrot.slane %v2637_v15, %v5707_v19 }
 0x684   : > { %v2441_v1 = vrot.slane %v2433_v35, %v5707_v19  ;;  %v2448_v56 = vrot.slane %v2434_v42, %v5707_v19  ;;  %5134 = vmatmul.mubr.msk.bf16.vlgmr.msra.gmra.mxu1 %vm3171_vm5, %v3348_v5  ;;  %v2669_v10 = vcombine.low %v2644_v23, %v2652_v55 }
 0x685   : > { %5144 = vmatpush3.bf16.msra.mxu1 %v6187_v8  ;;  %5145 = vmatprep.mubr.msk.bf16.mxu1 %vm5435_vm2, %v6819_v32  ;;  %v3291_v38 = vpop.xlane.xlu0 %3290  ;;  %v2653_v8 = vcombine.low %v6446_v46, %v2636_v14 }
 0x686   : > { %v2449_v13 = vcombine.low %v2425_v7, %v2441_v1  ;;  %v2450_v59 = vcombine.high %v2425_v7, %v2441_v1  ;;  %v2465_v54 = vcombine.low %v2432_v41, %v2448_v56  ;;  %v2466_v22 = vcombine.high %v2432_v41, %v2448_v56  ;;  %5155 = vmatprep.subr.bf16.mxu1 %v6819_v32 }
 0x687   : > { %5351 = vrcp.f32 %v3291_v38  ;;  %v2661_v26 = vrot.slane %v2653_v8, %v5723_v25  ;;  %v2677_v6 = vrot.slane %v2669_v10, %v5723_v25  ;;  %v2654_v7 = vcombine.high %v6446_v46, %v2636_v14 }
 0x688   : > { %v2457_v33 = vrot.slane %v2449_v13, %v5723_v25  ;;  %v2464_v30 = vrot.slane %v2450_v59, %v5723_v25  ;;  %v2473_v18 = vrot.slane %v2465_v54, %v5723_v25  ;;  %v2480_v0 = vrot.slane %v2466_v22, %v5723_v25 }
 0x689   : > { %5353 = vrcp.f32 %v3288_v50  ;;  %v2685_v29 = vcombine.low %v2661_v26, %v2677_v6  ;;  %v2686_v5 = vcombine.high %v2661_v26, %v2677_v6  ;;  %v2670_v41 = vcombine.high %v2644_v23, %v2652_v55 }
 0x68a   : > { %v2689_v39 = vcombine.low %v2457_v33, %v2464_v30  ;;  %v4961_v62 = vcombine.high %v2457_v33, %v2464_v30  ;;  %v2705_v61 = vcombine.low %v2473_v18, %v2480_v0  ;;  %v4962_v44 = vcombine.high %v2473_v18, %v2480_v0  ;;  %v3294_v18 = vpop.xlane.xlu0 %3293 }
 0x68b   : > { %v5348_v47 = vpop.eup %5347  ;;  %v2684_v46 = vrot.slane %v2670_v41, %v5723_v25  ;;  %5355 = vrcp.f32 %v6435_v4 }
 0x68c   : > { %v2696_v51 = vrot.slane %v2689_v39, %v5707_v19  ;;  %v2704_v11 = vrot.slane %v4961_v62, %v5707_v19  ;;  %v2712_v3 = vrot.slane %v2705_v61, %v5707_v19  ;;  %v2720_v60 = vrot.slane %v4962_v44, %v5707_v19  ;;  %v5350_v24 = vpop.eup %5349 }
 0x68d   : > { %v3335_v15 = vmul.f32 %v5348_v47, %v6366_v58  ;;  %v3334_v50 = vmul.f32 %v5350_v24, %v6356_v53  ;;  %v2668_v53 = vrot.slane %v2654_v7, %v5723_v25 }
 0x68e   : > { %v2721_v63 = vcombine.low %v2696_v51, %v2704_v11  ;;  %v2737_v20 = vcombine.low %v2712_v3, %v2720_v60  ;;  %v2722_v35 = vcombine.high %v2696_v51, %v2704_v11  ;;  %v2738_v42 = vcombine.high %v2712_v3, %v2720_v60 }
 0x68f   : > { %v3349_v1 = vpack.c.bf16 %v3335_v15, %v3334_v50  ;;  %v2687_v22 = vcombine.low %v2668_v53, %v2684_v46 }
 0x690   : > { %v2729_v34 = vrot.slane %v2721_v63, %v5723_v25  ;;  %v2745_v36 = vrot.slane %v2737_v20, %v5723_v25  ;;  %v2736_v59 = vrot.slane %v2722_v35, %v5723_v25  ;;  %v2752_v58 = vrot.slane %v2738_v42, %v5723_v25 }
 0x692   : > { %v2753_v9 = vcombine.low %v2729_v34, %v2745_v36  ;;  %v2754_v45 = vcombine.high %v2729_v34, %v2745_v36  ;;  %v2755_v23 = vcombine.low %v2736_v59, %v2752_v58  ;;  %v2756_v63 = vcombine.high %v2736_v59, %v2752_v58 }
 0x693   : > { %v2688_v36 = vcombine.high %v2668_v53, %v2684_v46 }
 0x694   : > { %v3357_v12 = vpack.c.bf16 %v2753_v9, %v2685_v29  ;;  %v5352_v56 = vpop.eup %5351  ;;  %v3359_v13 = vpack.c.bf16 %v2754_v45, %v2686_v5  ;;  %v3361_v30 = vpack.c.bf16 %v2755_v23, %v2687_v22 }
 0x695   : > { %v3339_v14 = vmul.f32 %v5352_v56, %v6374_v31  ;;  %v3300_v31 = vpop.xlane.xlu0 %3299  ;;  %v3363_v29 = vpack.c.bf16 %v2756_v63, %v2688_v36 }
 0x696   : > { %5138 = vmatpush3.bf16.msra.mxu0 %v3357_v12  ;;  %v5354_v54 = vpop.eup %5353 }
 0x697   : > { %5149 = vmatprep.subr.bf16.mxu0 %v6819_v32  ;;  %v3338_v55 = vmul.f32 %v5354_v54, %v6370_v40 }
 0x698   : > { %v5356_v10 = vpop.eup %5355 }
 0x699   : > { %5140 = vmatmul.mubr.msk.bf16.vlgmr.msra.gmra.mxu0 %vm3171_vm5, %v3349_v1  ;;  %v3351_v33 = vpack.c.bf16 %v3339_v14, %v3338_v55  ;;  %v3306_v40 = vpop.xlane.xlu0 %3305  ;;  %v3336_v44 = vmul.f32 %v5356_v10, %v6360_v57 }
 0x69a   : > { %5150 = vmatpush3.bf16.msra.mxu0 %v3359_v13  ;;  %5151 = vmatprep.mubr.msk.bf16.mxu0 %vm5435_vm2, %v6819_v32 }
 0x69b   : > { %5161 = vmatprep.subr.bf16.mxu0 %v6819_v32 }
 0x6a1   : > { %5152 = vmatmul.mubr.msk.bf16.vlgmr.msra.gmra.mxu0 %vm3171_vm5, %v3351_v33 }
 0x6a2   : > { %5162 = vmatpush3.bf16.msra.mxu0 %v3361_v30  ;;  %5163 = vmatprep.mubr.msk.bf16.mxu0 %vm5435_vm2, %v6819_v32 }
 0x6a3   : > { %5173 = vmatprep.subr.bf16.mxu0 %v6819_v32 }
 0x6b2   : > { %v3285_v0 = vpop.xlane.xlu1 %3284 }
 0x6b3   : > { %5357 = vrcp.f32 %v3285_v0 }
 0x6b6   : > { %v3297_v38 = vpop.xlane.xlu1 %3296 }
 0x6b7   : > { %5359 = vrcp.f32 %v3297_v38 }
 0x6b8   : > { %5361 = vrcp.f32 %v3294_v18 }
 0x6b9   : > { %5363 = vrcp.f32 %v3300_v31 }
 0x6bb   : > { %v3303_v8 = vpop.xlane.xlu1 %3302 }
 0x6bc   : > { %5365 = vrcp.f32 %v3303_v8 }
 0x6be   : > { %v3312_v62 = vpop.xlane.xlu0 %3311 }
 0x6bf   : > { %v3309_v39 = vpop.xlane.xlu1 %3308 }
 0x6c0   : > { %v5358_v61 = vpop.eup %5357  ;;  %5367 = vrcp.f32 %v3309_v39 }
 0x6c1   : > { %5369 = vrcp.f32 %v3306_v40  ;;  %v3337_v4 = vmul.f32 %v5358_v61, %v6401_v52 }
 0x6c2   : > { %5371 = vrcp.f32 %v3312_v62 }
 0x6c3   : > { %v3315_v51 = vpop.xlane.xlu1 %3314  ;;  %v3350_v11 = vpack.c.bf16 %v3337_v4, %v3336_v44 }
 0x6c4   : > { %v5360_v3 = vpop.eup %5359  ;;  %5373 = vrcp.f32 %v3315_v51 }
 0x6c5   : > { %5146 = vmatmul.mubr.msk.bf16.vlgmr.msra.gmra.mxu1 %vm3171_vm5, %v3350_v11  ;;  %v5362_v60 = vpop.eup %5361  ;;  %v3341_v57 = vmul.f32 %v5360_v3, %v6405_v28 }
 0x6c6   : > { %5156 = vmatpush3.bf16.msra.mxu1 %v6211_v48  ;;  %5157 = vmatprep.mubr.msk.bf16.mxu1 %vm5435_vm2, %v6819_v32  ;;  %v5364_v26 = vpop.eup %5363  ;;  %v3340_v52 = vmul.f32 %v5362_v60, %v6378_v17 }
 0x6c7   : > { %5167 = vmatprep.subr.bf16.mxu1 %v6819_v32  ;;  %v3342_v20 = vmul.f32 %v5364_v26, %v6382_v37 }
 0x6c8   : > { %v3352_v34 = vpack.c.bf16 %v3341_v57, %v3340_v52 }
 0x6c9   : > { %v5366_v6 = vpop.eup %5365 }
 0x6ca   : > { %v3343_v47 = vmul.f32 %v5366_v6, %v6409_v2 }
 0x6cc   : > { %v3353_v24 = vpack.c.bf16 %v3343_v47, %v3342_v20 }
 0x6cd   : > { %v5368_v48 = vpop.eup %5367  ;;  %5158 = vmatmul.mubr.msk.bf16.vlgmr.msra.gmra.mxu1 %vm3171_vm5, %v3352_v34 }
 0x6ce   : > { %v5370_v9 = vpop.eup %5369  ;;  %5164 = vmatmul.mubr.msk.bf16.vlgmr.msra.gmra.mxu0 %vm3171_vm5, %v3353_v24  ;;  %5168 = vmatpush3.bf16.msra.mxu1 %v6213_v49  ;;  %v3345_v17 = vmul.f32 %v5368_v48, %v6413_v43 }
 0x6cf   : > { %v5372_v28 = vpop.eup %5371  ;;  %5174 = vmatpush3.bf16.msra.mxu0 %v3363_v29  ;;  %5169 = vmatprep.mubr.msk.bf16.mxu1 %vm5435_vm2, %v6819_v32  ;;  %v3344_v2 = vmul.f32 %v5370_v9, %v6386_v27 }
 0x6d0   : > { %5175 = vmatprep.mubr.msk.bf16.mxu0 %vm5435_vm2, %v6819_v32  ;;  %v3346_v15 = vmul.f32 %v5372_v28, %v6415_v16 }
 0x6d1   : > { %v5374_v37 = vpop.eup %5373  ;;  %v3354_v45 = vpack.c.bf16 %v3345_v17, %v3344_v2 }
 0x6d2   : > { %v3347_v12 = vmul.f32 %v5374_v37, %v6421_v21 }
 0x6d4   : > { %v3355_v35 = vpack.c.bf16 %v3347_v12, %v3346_v15 }
 0x6d5   : > { %5170 = vmatmul.mubr.msk.bf16.vlgmr.msra.gmra.mxu1 %vm3171_vm5, %v3354_v45 }
 0x6d6   : > { %5176 = vmatmul.mubr.msk.bf16.vlgmr.msra.gmra.mxu0 %vm3171_vm5, %v3355_v35 }
 0x744   : > { %v3401_v49 = vpop.f32.mrf.mxu1 }
 0x746   : > { %v5135_v42 = vpop.f32.mrf.mxu1 }
 0x748   : > { %v3404_v50 = vpop.f32.mrf.mxu1 }
 0x74a   : > { %v5136_v43 = vpop.f32.mrf.mxu1 }
 0x759   : > { %v3445_v5 = vpop.f32.mrf.mxu0 }
 0x75b   : > { %v5141_v7 = vpop.f32.mrf.mxu0 }
 0x75d   : > { %v3448_v32 = vpop.f32.mrf.mxu0 }
 0x75f   : > { %v5142_v41 = vpop.f32.mrf.mxu0 }
 0x761   : > { %v3533_v1 = vpop.f32.mrf.mxu0 }
 0x763   : > { %v5153_v27 = vpop.f32.mrf.mxu0 }
 0x765   : > { %v6514_v56 = vpop.f32.mrf.mxu0 }
 0x767   : > { %v5154_v16 = vpop.f32.mrf.mxu0 }
 0x785   : > { %v3489_v21 = vpop.f32.mrf.mxu1 }
 0x787   : > { %v5147_v13 = vpop.f32.mrf.mxu1 }
 0x789   : > { %v6516_v59 = vpop.f32.mrf.mxu1 }
 0x78b   : > { %v5148_v58 = vpop.f32.mrf.mxu1 }
 0x78d   : > { %v3577_v54 = vpop.f32.mrf.mxu1 }
 0x78e   : > { %v3621_v53 = vpop.f32.mrf.mxu0  ;;  %v3716_v55 = vcombine.low %v3401_v49, %v3577_v54  ;;  %v3717_v22 = vcombine.high %v3401_v49, %v3577_v54 }
 0x78f   : > { %v5159_v46 = vpop.f32.mrf.mxu1  ;;  %v3852_v30 = vcombine.low %v3445_v5, %v3621_v53  ;;  %v3853_v18 = vcombine.high %v3445_v5, %v3621_v53 }
 0x790   : > { %v5165_v14 = vpop.f32.mrf.mxu0  ;;  %v3724_v62 = vrot.slane %v3716_v55, %v5707_v19  ;;  %v3731_v61 = vrot.slane %v3717_v22, %v5707_v19 }
 0x791   : > { %v3580_v23 = vpop.f32.mrf.mxu1  ;;  %v3860_v11 = vrot.slane %v3852_v30, %v5707_v19  ;;  %v3867_v3 = vrot.slane %v3853_v18, %v5707_v19 }
 0x792   : > { %v3624_v33 = vpop.f32.mrf.mxu0  ;;  %v3784_v31 = vcombine.low %v3404_v50, %v3580_v23  ;;  %v3785_v38 = vcombine.high %v3404_v50, %v3580_v23 }
 0x793   : > { %v5160_v0 = vpop.f32.mrf.mxu1  ;;  %v3920_v8 = vcombine.low %v3448_v32, %v3624_v33  ;;  %v3921_v10 = vcombine.high %v3448_v32, %v3624_v33 }
 0x794   : > { %v5166_v40 = vpop.f32.mrf.mxu0  ;;  %v6523_v6 = vrot.slane %v3784_v31, %v5707_v19  ;;  %v6526_v52 = vrot.slane %v3785_v38, %v5707_v19 }
 0x795   : > { %v3665_v39 = vpop.f32.mrf.mxu1  ;;  %v6531_v34 = vrot.slane %v3920_v8, %v5707_v19  ;;  %v6534_v36 = vrot.slane %v3921_v10, %v5707_v19 }
 0x796   : > { %v3732_v44 = vcombine.low %v3489_v21, %v3665_v39  ;;  %v3733_v4 = vcombine.high %v3489_v21, %v3665_v39  ;;  %v3709_v51 = vpop.f32.mrf.mxu0 }
 0x797   : > { %v3868_v60 = vcombine.low %v3533_v1, %v3709_v51  ;;  %v3869_v26 = vcombine.high %v3533_v1, %v3709_v51  ;;  %v5171_v57 = vpop.f32.mrf.mxu1 }
 0x798   : > { %v3740_v63 = vrot.slane %v3732_v44, %v5707_v19  ;;  %v3747_v20 = vrot.slane %v3733_v4, %v5707_v19  ;;  %v5177_v47 = vpop.f32.mrf.mxu0 }
 0x799   : > { %v3876_v24 = vrot.slane %v3868_v60, %v5707_v19  ;;  %v3883_v48 = vrot.slane %v3869_v26, %v5707_v19  ;;  %v3668_v29 = vpop.f32.mrf.mxu1 }
 0x79a   : > { %v3748_v9 = vcombine.low %v3724_v62, %v3740_v63  ;;  %v3749_v28 = vcombine.high %v3724_v62, %v3740_v63  ;;  %v3764_v17 = vcombine.low %v3731_v61, %v3747_v20  ;;  %v3765_v37 = vcombine.high %v3731_v61, %v3747_v20  ;;  %v3712_v2 = vpop.f32.mrf.mxu0 }
 0x79b   : > { %v3884_v15 = vcombine.low %v3860_v11, %v3876_v24  ;;  %v3885_v12 = vcombine.high %v3860_v11, %v3876_v24  ;;  %v3900_v45 = vcombine.low %v3867_v3, %v3883_v48  ;;  %v3901_v35 = vcombine.high %v3867_v3, %v3883_v48  ;;  %v5172_v49 = vpop.f32.mrf.mxu1 }
 0x79c   : > { %v3756_v42 = vrot.slane %v3748_v9, %v5723_v25  ;;  %v3763_v50 = vrot.slane %v3749_v28, %v5723_v25  ;;  %v3772_v43 = vrot.slane %v3764_v17, %v5723_v25  ;;  %v3779_v5 = vrot.slane %v3765_v37, %v5723_v25  ;;  %v5178_v7 = vpop.f32.mrf.mxu0 }
 0x79d   : > { %v3892_v32 = vrot.slane %v3884_v15, %v5723_v25  ;;  %v3899_v41 = vrot.slane %v3885_v12, %v5723_v25  ;;  %v3908_v1 = vrot.slane %v3900_v45, %v5723_v25  ;;  %v3915_v27 = vrot.slane %v3901_v35, %v5723_v25 }
 0x79e   : > { %v3988_v16 = vcombine.low %v3756_v42, %v3763_v50  ;;  %v4979_v21 = vcombine.high %v3756_v42, %v3763_v50  ;;  %v4004_v13 = vcombine.low %v3772_v43, %v3779_v5  ;;  %v4980_v58 = vcombine.high %v3772_v43, %v3779_v5 }
 0x79f   : > { %v4124_v54 = vcombine.low %v3892_v32, %v3899_v41  ;;  %v4983_v53 = vcombine.high %v3892_v32, %v3899_v41  ;;  %v4140_v46 = vcombine.low %v3908_v1, %v3915_v27  ;;  %v4984_v14 = vcombine.high %v3908_v1, %v3915_v27 }
 0x7a0   : > { %v3995_v23 = vrot.slane %v3988_v16, %v5707_v19  ;;  %v4003_v55 = vrot.slane %v4979_v21, %v5707_v19  ;;  %v4011_v22 = vrot.slane %v4004_v13, %v5707_v19  ;;  %v4019_v33 = vrot.slane %v4980_v58, %v5707_v19 }
 0x7a1   : > { %v6551_v30 = vrot.slane %v4124_v54, %v5707_v19  ;;  %v6554_v18 = vrot.slane %v4983_v53, %v5707_v19  ;;  %v6557_v0 = vrot.slane %v4140_v46, %v5707_v19  ;;  %v6560_v31 = vrot.slane %v4984_v14, %v5707_v19 }
 0x7a2   : > { %v3800_v38 = vcombine.low %v6516_v59, %v3668_v29  ;;  %v3801_v40 = vcombine.high %v6516_v59, %v3668_v29  ;;  %v3936_v8 = vcombine.low %v6514_v56, %v3712_v2  ;;  %v3937_v10 = vcombine.high %v6514_v56, %v3712_v2 }
 0x7a3   : > { %v4021_v39 = vcombine.high %v3995_v23, %v4003_v55  ;;  %v4037_v62 = vcombine.high %v4011_v22, %v4019_v33  ;;  %v4020_v61 = vcombine.low %v3995_v23, %v4003_v55  ;;  %v4036_v44 = vcombine.low %v4011_v22, %v4019_v33 }
 0x7a4   : > { %v3808_v4 = vrot.slane %v3800_v38, %v5707_v19  ;;  %v3815_v51 = vrot.slane %v3801_v40, %v5707_v19  ;;  %v3944_v11 = vrot.slane %v3936_v8, %v5707_v19  ;;  %v3951_v3 = vrot.slane %v3937_v10, %v5707_v19 }
 0x7a5   : > { %v6571_v60 = vrot.slane %v4021_v39, %v5723_v25  ;;  %v6574_v59 = vrot.slane %v4037_v62, %v5723_v25  ;;  %v6577_v56 = vrot.slane %v4020_v61, %v5723_v25  ;;  %v6580_v26 = vrot.slane %v4036_v44, %v5723_v25 }
 0x7a6   : > { %v3816_v57 = vcombine.low %v6523_v6, %v3808_v4  ;;  %v3817_v63 = vcombine.high %v6523_v6, %v3808_v4  ;;  %v3832_v20 = vcombine.low %v6526_v52, %v3815_v51  ;;  %v3833_v47 = vcombine.high %v6526_v52, %v3815_v51 }
 0x7a7   : > { %v3952_v24 = vcombine.low %v6531_v34, %v3944_v11  ;;  %v3953_v48 = vcombine.high %v6531_v34, %v3944_v11  ;;  %v3968_v29 = vcombine.low %v6534_v36, %v3951_v3  ;;  %v3969_v9 = vcombine.high %v6534_v36, %v3951_v3  ;;  %v5291_v3 = vld [vmem:[%s6831_s19 + $0x8] sm:$0xff]  }
 0x7a8   : > { %v3824_v28 = vrot.slane %v3816_v57, %v5723_v25  ;;  %v3831_v17 = vrot.slane %v3817_v63, %v5723_v25  ;;  %v3840_v37 = vrot.slane %v3832_v20, %v5723_v25  ;;  %v3847_v6 = vrot.slane %v3833_v47, %v5723_v25  ;;  %5179 = vmatprep.subr.bf16.mxu1 %v5291_v3 }
 0x7a9   : > { %v3960_v2 = vrot.slane %v3952_v24, %v5723_v25  ;;  %v3967_v52 = vrot.slane %v3953_v48, %v5723_v25  ;;  %v3976_v15 = vrot.slane %v3968_v29, %v5723_v25  ;;  %v3983_v34 = vrot.slane %v3969_v9, %v5723_v25  ;;  %5180 = vmatpush3.bf16.msra.mxu1 %v5291_v3  ;;  %v5399_v3 = vld [vmem:[#allocation2] sm:$0xff] }
 0x7aa   : > { %v4056_v12 = vcombine.low %v3824_v28, %v3831_v17  ;;  %v4981_v45 = vcombine.high %v3824_v28, %v3831_v17  ;;  %v4072_v35 = vcombine.low %v3840_v37, %v3847_v6  ;;  %v4982_v36 = vcombine.high %v3840_v37, %v3847_v6 }
 0x7ab   : > { %v4192_v49 = vcombine.low %v3960_v2, %v3967_v52  ;;  %v4985_v42 = vcombine.high %v3960_v2, %v3967_v52  ;;  %v4208_v50 = vcombine.low %v3976_v15, %v3983_v34  ;;  %v4986_v43 = vcombine.high %v3976_v15, %v3983_v34  ;;  %v5292_v34 = vld [vmem:[%s6831_s19] sm:$0xff]  }
 0x7ac   : > { %v4063_v5 = vrot.slane %v4056_v12, %v5707_v19  ;;  %v4071_v7 = vrot.slane %v4981_v45, %v5707_v19  ;;  %v4079_v32 = vrot.slane %v4072_v35, %v5707_v19  ;;  %v4087_v41 = vrot.slane %v4982_v36, %v5707_v19  ;;  %5181 = vmatprep.subr.bf16.mxu1 %v5292_v34 }
 0x7ad   : > { %v4199_v1 = vrot.slane %v4192_v49, %v5707_v19  ;;  %v4207_v27 = vrot.slane %v4985_v42, %v5707_v19  ;;  %v4215_v16 = vrot.slane %v4208_v50, %v5707_v19  ;;  %v4223_v21 = vrot.slane %v4986_v43, %v5707_v19  ;;  %5182 = vmatpush3.bf16.msra.mxu1 %v5292_v34 }
 0x7ae   : > { %v4089_v13 = vcombine.high %v4063_v5, %v4071_v7  ;;  %v4105_v58 = vcombine.high %v4079_v32, %v4087_v41  ;;  %v4052_v54 = vcombine.low %v6577_v56, %v6580_v26  ;;  %v4054_v53 = vcombine.low %v6571_v60, %v6574_v59 }
 0x7af   : > { %v4088_v46 = vcombine.low %v4063_v5, %v4071_v7  ;;  %v4104_v14 = vcombine.low %v4079_v32, %v4087_v41  ;;  %v4156_v22 = vcombine.low %v6551_v30, %v6554_v18  ;;  %v4172_v19 = vcombine.low %v6557_v0, %v6560_v31 }
 0x7b0   : > { %v4103_v23 = vrot.slane %v4089_v13, %v5723_v25  ;;  %v4119_v55 = vrot.slane %v4105_v58, %v5723_v25  ;;  %v4224_v40 = vcombine.low %v4199_v1, %v4207_v27  ;;  %v4240_v8 = vcombine.low %v4215_v16, %v4223_v21 }
 0x7b1   : > { %v4096_v33 = vrot.slane %v4088_v46, %v5723_v25  ;;  %v4112_v38 = vrot.slane %v4104_v14, %v5723_v25  ;;  %v4053_v39 = vcombine.high %v6577_v56, %v6580_v26  ;;  %v6621_v62 = vrot.slane %v4156_v22, %v5723_v25 }
 0x7b2   : > { %v4122_v10 = vcombine.low %v4103_v23, %v4119_v55  ;;  %v6624_v61 = vrot.slane %v4172_v19, %v5723_v25  ;;  %v6627_v51 = vrot.slane %v4224_v40, %v5723_v25  ;;  %v6630_v11 = vrot.slane %v4240_v8, %v5723_v25 }
 0x7b3   : > { %v4121_v44 = vcombine.high %v4096_v33, %v4112_v38  ;;  %v4120_v4 = vcombine.low %v4096_v33, %v4112_v38  ;;  %v4123_v63 = vcombine.high %v4103_v23, %v4119_v55  ;;  %v4157_v9 = vcombine.high %v6551_v30, %v6554_v18 }
 0x7b4   : > { %v5264_v57 = vpack.i.bf16 %v4122_v10, %v4054_v53  ;;  %v4188_v20 = vcombine.low %v6621_v62, %v6624_v61  ;;  %v4189_v47 = vcombine.high %v6621_v62, %v6624_v61  ;;  %v4257_v48 = vcombine.high %v6627_v51, %v6630_v11  ;;  %v4987_v61 = vld [vmem:[%s6832_s24] ss:$0 sm:$0xff] }
 0x7b5   : > { %v5259_v24 = vpack.i.bf16 %v4121_v44, %v4053_v39  ;;  %v4256_v29 = vcombine.low %v6627_v51, %v6630_v11  ;;  %v4173_v28 = vcombine.high %v6557_v0, %v6560_v31  ;;  %v4225_v17 = vcombine.high %v4199_v1, %v4207_v27 }
 0x7b6   : > { %5265 = vrot.lane.b32.xlu1 %v5264_v57, %s5436_s17  ;;  %v4241_v37 = vcombine.high %v4215_v16, %v4223_v21  ;;  %v4055_v6 = vcombine.high %v6571_v60, %v6574_v59  ;;  %v5274_v2 = vpack.i.bf16 %v4257_v48, %v4189_v47  ;;  %v4171_v52 = vrot.slane %v4157_v9, %v5723_v25  ;;  %v5401_v9 = vld [vmem:[#allocation2 + $0x8] sm:$0xff] }
 0x7b7   : > { %5260 = vrot.lane.b32.xlu0 %v5259_v24, %s5437_s27  ;;  %v4187_v30 = vrot.slane %v4173_v28, %v5723_v25  ;;  %v4239_v18 = vrot.slane %v4225_v17, %v5723_v25  ;;  %v5402_v17 = vld [vmem:[#allocation2 + $0x18] sm:$0xff] }
 0x7b8   : > { %v4255_v15 = vrot.slane %v4241_v37, %v5723_v25  ;;  %v5269_v12 = vpack.i.bf16 %v4123_v63, %v4055_v6 }
 0x7b9   : > { %v4190_v0 = vcombine.low %v4171_v52, %v4187_v30  ;;  %v4191_v45 = vcombine.high %v4171_v52, %v4187_v30 }
 0x7ba   : > { %5275 = vrot.lane.b32.xlu1 %v5274_v2, %s5437_s27  ;;  %v4258_v31 = vcombine.low %v4239_v18, %v4255_v15  ;;  %v4259_v35 = vcombine.high %v4239_v18, %v4255_v15 }
 0x7bb   : > { %5270 = vrot.lane.b32.xlu0 %v5269_v12, %s5438_s22 }
 0x7bc   : > { %v5279_v60 = vpack.i.bf16 %v4258_v31, %v4190_v0  ;;  %v5284_v59 = vpack.i.bf16 %v4259_v35, %v4191_v45 }
 0x7be   : > { %5280 = vrot.lane.b32.xlu1 %v5279_v60, %s5436_s17 }
 0x7c2   : > { %5285 = vrot.lane.b32.xlu1 %v5284_v59, %s5438_s22 }
 0x828   : > { %v5266_v36 = vpop.permute.xlu1 %5265 }
 0x829   : > { %v5261_v49 = vpop.permute.xlu0 %5260  ;;  %v5268_v25 = vunpack.i.h.bf16 %v5266_v36  ;;  %v5267_v43 = vunpack.i.l.bf16 %v5266_v36 }
 0x82a   : > { %v5263_v42 = vunpack.i.h.bf16 %v5261_v49  ;;  %v5262_v50 = vunpack.i.l.bf16 %v5261_v49 }
 0x82c   : > { %v4309_v5 = vsel %vm2773_vm3, %v4120_v4, %v5263_v42  ;;  %v4308_v7 = vsel %vm2773_vm3, %v4052_v54, %v5262_v50  ;;  %v5276_v32 = vpop.permute.xlu1 %5275 }
 0x82d   : > { %v5271_v41 = vpop.permute.xlu0 %5270  ;;  %v4312_v16 = vsel %vm3171_vm5, %v4308_v7, %v5267_v43  ;;  %v4313_v21 = vsel %vm3171_vm5, %v4309_v5, %v5268_v25  ;;  %v5278_v46 = vunpack.i.h.bf16 %v5276_v32  ;;  %v5277_v14 = vunpack.i.l.bf16 %v5276_v32 }
 0x82e   : > { %v5273_v1 = vunpack.i.h.bf16 %v5271_v41  ;;  %v5272_v27 = vunpack.i.l.bf16 %v5271_v41  ;;  %v5293_v41 = vld [vmem:[%s5586_s6 + $0x8] sm:$0xff]  }
 0x82f   : > { %v4310_v55 = vsel %vm2773_vm3, %v4188_v20, %v5277_v14  ;;  %v4311_v22 = vsel %vm2773_vm3, %v4256_v29, %v5278_v46  ;;  %v5400_v20 = vld [vmem:[#allocation2 + $0x10] sm:$0xff]  ;;  %5187 = vmatprep.subr.bf16.mxu0 %v5293_v41 }
 0x830   : > { %v4317_v13 = vsel %vm4316_vm6, %v4312_v16, %v5272_v27  ;;  %v4318_v58 = vsel %vm4316_vm6, %v4313_v21, %v5273_v1  ;;  %v5281_v53 = vpop.permute.xlu1 %5280  ;;  %v5294_v1 = vld [vmem:[%s5586_s6] sm:$0xff]   ;;  %5188 = vmatpush3.bf16.msra.mxu0 %v5293_v41 }
 0x831   : > { %v4321_v23 = vpack.c.bf16 %v4318_v58, %v4317_v13  ;;  %v5283_v56 = vunpack.i.h.bf16 %v5281_v53  ;;  %v5282_v26 = vunpack.i.l.bf16 %v5281_v53  ;;  %5189 = vmatprep.subr.bf16.mxu0 %v5294_v1 }
 0x833   : > { %5183 = vmatprep.mubr.msk.bf16.mxu1 %vm835_vm1, %v4321_v23  ;;  %v4314_v38 = vsel %vm3171_vm5, %v4310_v55, %v5282_v26  ;;  %v4315_v40 = vsel %vm3171_vm5, %v4311_v22, %v5283_v56 }
 0x834   : > { %v5286_v54 = vpop.permute.xlu1 %5285  ;;  %5190 = vmatpush3.bf16.msra.mxu0 %v5294_v1 }
 0x835   : > { %v5288_v19 = vunpack.i.h.bf16 %v5286_v54  ;;  %v5287_v33 = vunpack.i.l.bf16 %v5286_v54 }
 0x837   : > { %v4319_v8 = vsel %vm4316_vm6, %v4314_v38, %v5287_v33  ;;  %v4320_v10 = vsel %vm4316_vm6, %v4315_v40, %v5288_v19  ;;  %v4992_v19 = vld [vmem:[%s707_s5] ss:$0 sm:$0xff] }
 0x838   : > { %v4322_v39 = vpack.c.bf16 %v4320_v10, %v4319_v8 }
 0x83a   : > { %5184 = vmatmul.mubr.msk.bf16.vlgmr.msra.gmra.mxu1 %vm835_vm1, %v4322_v39  ;;  %v4993_v39 = vld [vmem:[%s710_s20] ss:$0 sm:$0xff] }
 0x8fa   : > { %v5185_v62 = vpop.f32.mrf.mxu1 }
 0x8fb   : > { %v4395_v4 = vadd.f32 %v5185_v62, %v4987_v61 }
 0x8fc   : > { %v4386_v44 = vpop.f32.mrf.mxu1 }
 0x8fd   : > { %v4387_v51 = vadd.f32 %v4987_v61, %v4386_v44  ;;  %v6676_v47 = vadd.f32 %v5400_v20, %v4395_v4 }
 0x8fe   : > { %v5186_v11 = vpop.f32.mrf.mxu1 }
 0x8ff   : > { %v6674_v57 = vadd.f32 %v5399_v3, %v4387_v51  ;;  %v4398_v24 = vadd.f32 %v5186_v11, %v4987_v61  ;;  %v4413_v2 = vsel %vm835_vm1, %v6676_v47, 0.0 }
 0x900   : > { %v4389_v63 = vpop.f32.mrf.mxu1 }
 0x901   : > { %v4390_v48 = vadd.f32 %v4987_v61, %v4389_v63  ;;  %v4407_v29 = vsel %vm835_vm1, %v6674_v57, 0.0  ;;  %v6682_v37 = vadd.f32 %v5402_v17, %v4398_v24  ;;  %v5297_v17 = vld [vmem:[%s5596_s29 + $0x28] sm:$0xff]  }
 0x902   : > { %4408 = vadd.xlane.f32.xlu0 %v4407_v29  ;;  %v5295_v29 = vld [vmem:[%s5596_s29 + $0x38] sm:$0xff]  }
 0x903   : > { %v6680_v28 = vadd.f32 %v5401_v9, %v4390_v48  ;;  %v4416_v52 = vsel %vm835_vm1, %v6682_v37, 0.0  ;;  %5195 = vmatprep.subr.bf16.mxu1 %v5295_v29  ;;  %v5296_v9 = vld [vmem:[%s5596_s29 + $0x30] sm:$0xff]  }
 0x904   : > { %5196 = vmatpush3.bf16.msra.mxu1 %v5295_v29 }
 0x905   : > { %v4410_v6 = vsel %vm835_vm1, %v6680_v28, 0.0  ;;  %5197 = vmatprep.subr.bf16.mxu1 %v5296_v9 }
 0x906   : > { %4411 = vadd.xlane.f32.xlu1 %v4410_v6  ;;  %4414 = vadd.xlane.f32.xlu0 %v4413_v2  ;;  %v5298_v6 = vld [vmem:[%s5596_s29 + $0x20] sm:$0xff]   ;;  %v5299_v2 = vld [vmem:[%s5596_s29 + $0x18] sm:$0xff]  }
 0x908   : > { %5198 = vmatpush3.bf16.msra.mxu1 %v5296_v9 }
 0x909   : > { %5199 = vmatprep.subr.bf16.mxu1 %v5297_v17 }
 0x90a   : > { %4417 = vadd.xlane.f32.xlu0 %v4416_v52  ;;  %v5300_v52 = vld [vmem:[%s5596_s29 + $0x10] sm:$0xff]  }
 0x90c   : > { %5200 = vmatpush3.bf16.msra.mxu1 %v5297_v17 }
 0x90d   : > { %5201 = vmatprep.subr.bf16.mxu1 %v5298_v6 }
 0x910   : > { %5202 = vmatpush3.bf16.msra.mxu1 %v5298_v6 }
 0x911   : > { %5203 = vmatprep.subr.bf16.mxu1 %v5299_v2 }
 0x914   : > { %5204 = vmatpush3.bf16.msra.mxu1 %v5299_v2 }
 0x915   : > { %5205 = vmatprep.subr.bf16.mxu1 %v5300_v52 }
 0x918   : > { %5206 = vmatpush3.bf16.msra.mxu1 %v5300_v52 }
 0x98b   : > { %v4409_v30 = vpop.xlane.xlu0 %4408 }
 0x98c   : > { %v4419_v18 = vmul.f32 0.03125, %v4409_v30  ;;  %v5301_v30 = vld [vmem:[%s5596_s29 + $0x8] sm:$0xff]  }
 0x98d   : > { %5207 = vmatprep.subr.bf16.mxu1 %v5301_v30 }
 0x98e   : > { %v4423_v15 = vsub.f32 %v6674_v57, %v4419_v18  ;;  %v5302_v18 = vld [vmem:[%s5596_s29] sm:$0xff]   ;;  %5208 = vmatpush3.bf16.msra.mxu1 %v5301_v30 }
 0x98f   : > { %v4412_v34 = vpop.xlane.xlu1 %4411  ;;  %v4415_v12 = vpop.xlane.xlu0 %4414  ;;  %5209 = vmatprep.subr.bf16.mxu1 %v5302_v18 }
 0x990   : > { %v4420_v0 = vmul.f32 0.03125, %v4412_v34  ;;  %v4421_v31 = vmul.f32 0.03125, %v4415_v12  ;;  %v4427_v45 = vmul.f32 %v4423_v15, %v4423_v15 }
 0x992   : > { %v4424_v35 = vsub.f32 %v6680_v28, %v4420_v0  ;;  %v4425_v60 = vsub.f32 %v6676_v47, %v4421_v31  ;;  %v4431_v59 = vsel %vm835_vm1, %v4427_v45, 0.0  ;;  %5210 = vmatpush3.bf16.msra.mxu1 %v5302_v18 }
 0x993   : > { %4432 = vadd.xlane.f32.xlu0 %v4431_v59  ;;  %v4418_v36 = vpop.xlane.xlu0 %4417 }
 0x994   : > { %v4422_v49 = vmul.f32 0.03125, %v4418_v36  ;;  %v4428_v42 = vmul.f32 %v4424_v35, %v4424_v35  ;;  %v4429_v50 = vmul.f32 %v4425_v60, %v4425_v60 }
 0x996   : > { %v4426_v25 = vsub.f32 %v6682_v37, %v4422_v49  ;;  %v4434_v43 = vsel %vm835_vm1, %v4428_v42, 0.0  ;;  %v4437_v5 = vsel %vm835_vm1, %v4429_v50, 0.0 }
 0x997   : > { %4435 = vadd.xlane.f32.xlu1 %v4434_v43  ;;  %4438 = vadd.xlane.f32.xlu0 %v4437_v5 }
 0x998   : > { %v4430_v7 = vmul.f32 %v4426_v25, %v4426_v25 }
 0x99a   : > { %v4440_v32 = vsel %vm835_vm1, %v4430_v7, 0.0 }
 0x99b   : > { %4441 = vadd.xlane.f32.xlu1 %v4440_v32 }
 0xa1c   : > { %v4433_v27 = vpop.xlane.xlu0 %4432 }
 0xa1d   : > { %v4443_v16 = vmul.f32 0.03125, %v4433_v27 }
 0xa1f   : > { %v4447_v21 = vadd.f32 1e-05, %v4443_v16 }
 0xa20   : > { %v4436_v13 = vpop.xlane.xlu1 %4435  ;;  %v4439_v58 = vpop.xlane.xlu0 %4438 }
 0xa21   : > { %5375 = vrsqrt.f32 %v4447_v21  ;;  %v4444_v53 = vmul.f32 0.03125, %v4436_v13  ;;  %v4445_v46 = vmul.f32 0.03125, %v4439_v58 }
 0xa23   : > { %v4448_v14 = vadd.f32 1e-05, %v4444_v53  ;;  %v4449_v23 = vadd.f32 1e-05, %v4445_v46 }
 0xa24   : > { %v4442_v56 = vpop.xlane.xlu1 %4441 }
 0xa25   : > { %5377 = vrsqrt.f32 %v4448_v14  ;;  %v4446_v26 = vmul.f32 0.03125, %v4442_v56 }
 0xa26   : > { %5379 = vrsqrt.f32 %v4449_v23 }
 0xa27   : > { %v4450_v54 = vadd.f32 1e-05, %v4446_v26 }
 0xa29   : > { %5381 = vrsqrt.f32 %v4450_v54 }
 0xa2e   : > { %v5376_v55 = vpop.eup %5375 }
 0xa2f   : > { %v4455_v22 = vmul.f32 %v5376_v55, %v4423_v15  ;;  %v4994_v15 = vld [vmem:[%s718_s8] ss:$0 sm:$0xff] }
 0xa31   : > { %v4465_v8 = vmul.f32 %v4992_v19, %v4455_v22 }
 0xa32   : > { %v5378_v33 = vpop.eup %5377 }
 0xa33   : > { %v5380_v38 = vpop.eup %5379  ;;  %v4456_v40 = vmul.f32 %v5378_v33, %v4424_v35  ;;  %v4475_v4 = vadd.f32 %v4993_v39, %v4465_v8  ;;  %v5003_v33 = vld [vmem:[%s726_s18] ss:$0 sm:$0xff] }
 0xa34   : > { %v4457_v10 = vmul.f32 %v5380_v38, %v4425_v60 }
 0xa35   : > { %v4466_v62 = vmul.f32 %v4992_v19, %v4456_v40 }
 0xa36   : > { %v5382_v61 = vpop.eup %5381  ;;  %v4467_v11 = vmul.f32 %v4992_v19, %v4457_v10 }
 0xa37   : > { %v4458_v44 = vmul.f32 %v5382_v61, %v4426_v25  ;;  %v4476_v51 = vadd.f32 %v4993_v39, %v4466_v62 }
 0xa38   : > { %v4477_v20 = vadd.f32 %v4993_v39, %v4467_v11 }
 0xa39   : > { %v4479_v3 = vpack.c.bf16 %v4476_v51, %v4475_v4  ;;  %v4468_v63 = vmul.f32 %v4992_v19, %v4458_v44 }
 0xa3b   : > { %5191 = vmatprep.mubr.msk.bf16.mxu0 %vm835_vm1, %v4479_v3  ;;  %v4478_v24 = vadd.f32 %v4993_v39, %v4468_v63 }
 0xa3d   : > { %v4480_v48 = vpack.c.bf16 %v4478_v24, %v4477_v20 }
 0xa3f   : > { %5192 = vmatmul.mubr.msk.bf16.vlgmr.msra.gmra.mxu0 %vm835_vm1, %v4480_v48 }
 0xaff   : > { %v5193_v34 = vpop.f32.mrf.mxu0 }
 0xb00   : > { %v4553_v12 = vadd.f32 %v5193_v34, %v4994_v15 }
 0xb01   : > { %v4544_v0 = vpop.f32.mrf.mxu0 }
 0xb02   : > { %v5001_v31 = vmul.f32 -1.702, %v4553_v12  ;;  %v4545_v45 = vadd.f32 %v4994_v15, %v4544_v0 }
 0xb03   : > { %v5194_v35 = vpop.f32.mrf.mxu0 }
 0xb04   : > { %v4571_v60 = vmul.f32 1.442695, %v5001_v31  ;;  %v4999_v59 = vmul.f32 -1.702, %v4545_v45  ;;  %v4556_v36 = vadd.f32 %v5194_v35, %v4994_v15 }
 0xb05   : > { %v4547_v49 = vpop.f32.mrf.mxu0 }
 0xb06   : > { %v4567_v42 = vmul.f32 1.442695, %v4999_v59  ;;  %v5002_v50 = vmul.f32 -1.702, %v4556_v36  ;;  %v4548_v25 = vadd.f32 %v4994_v15, %v4547_v49  ;;  %5383 = vpow2.f32 %v4571_v60 }
 0xb08   : > { %5385 = vpow2.f32 %v4567_v42  ;;  %v4573_v43 = vmul.f32 1.442695, %v5002_v50  ;;  %v5000_v5 = vmul.f32 -1.702, %v4548_v25 }
 0xb0a   : > { %5387 = vpow2.f32 %v4573_v43  ;;  %v4569_v7 = vmul.f32 1.442695, %v5000_v5 }
 0xb0c   : > { %5389 = vpow2.f32 %v4569_v7 }
 0xb13   : > { %v5384_v32 = vpop.eup %5383 }
 0xb14   : > { %v4577_v16 = vadd.f32 1.0, %v5384_v32 }
 0xb15   : > { %v5386_v41 = vpop.eup %5385 }
 0xb16   : > { %v4575_v1 = vadd.f32 1.0, %v5386_v41 }
 0xb17   : > { %v5388_v27 = vpop.eup %5387 }
 0xb18   : > { %v4578_v21 = vadd.f32 1.0, %v5388_v27  ;;  %5391 = vrcp.f32 %v4575_v1 }
 0xb19   : > { %v5390_v13 = vpop.eup %5389 }
 0xb1a   : > { %5393 = vrcp.f32 %v4578_v21  ;;  %v4576_v58 = vadd.f32 1.0, %v5390_v13 }
 0xb1b   : > { %5395 = vrcp.f32 %v4577_v16 }
 0xb1c   : > { %5397 = vrcp.f32 %v4576_v58 }
 0xb25   : > { %v5392_v53 = vpop.eup %5391 }
 0xb26   : > { %v4587_v26 = vmul.f32 %v5392_v53, %v4545_v45 }
 0xb27   : > { %v5394_v46 = vpop.eup %5393 }
 0xb28   : > { %v5396_v14 = vpop.eup %5395  ;;  %v4590_v56 = vmul.f32 %v5394_v46, %v4556_v36 }
 0xb29   : > { %v5398_v23 = vpop.eup %5397  ;;  %v4589_v55 = vmul.f32 %v5396_v14, %v4553_v12 }
 0xb2a   : > { %v4588_v54 = vmul.f32 %v5398_v23, %v4548_v25 }
 0xb2b   : > { %v4592_v19 = vpack.c.bf16 %v4590_v56, %v4589_v55 }
 0xb2c   : > { %v4591_v22 = vpack.c.bf16 %v4588_v54, %v4587_v26 }
 0xb2e   : > { %5211 = vmatprep.mubr.bf16.mxu1 %v4591_v22 }
 0xb2f   : > { %5212 = vmatmul.mubr.bf16.vlgmr.msra.gmra.mxu1 %v4592_v19 }
 0xbef   : > { %v5213_v38 = vpop.f32.mrf.mxu1 }
 0xbf0   : > { %v4707_v40 = vadd.f32 %v5213_v38, %v5003_v33 }
 0xbf1   : > { %v4698_v8 = vpop.f32.mrf.mxu1 }
 0xbf2   : > { %v4715_v10 = vadd.f32 %v4707_v40, %v6676_v47  ;;  %v4699_v39 = vadd.f32 %v5003_v33, %v4698_v8 }
 0xbf3   : > { %v5214_v62 = vpop.f32.mrf.mxu1 }
 0xbf4   : > { %4719 = vst.msk [vmem:[#allocation2 + $0x10] sm:$0xff] %vm835_vm1, %v4715_v10  ;;  %v4713_v61 = vadd.f32 %v4699_v39, %v6674_v57  ;;  %v4710_v44 = vadd.f32 %v5214_v62, %v5003_v33 }
 0xbf5   : > { %v4701_v4 = vpop.f32.mrf.mxu1 }
 0xbf6   : > { %4717 = vst.msk [vmem:[#allocation2] sm:$0xff] %vm835_vm1, %v4713_v61  ;;  %v4716_v51 = vadd.f32 %v4710_v44, %v6682_v37  ;;  %v4702_v11 = vadd.f32 %v5003_v33, %v4701_v4  ;;  %4724 = sbr.rel (%p5012_p6) target bundleno = 3069 (0xbfd), region = 92 }
 0xbf8   : > { %4720 = vst.msk [vmem:[#allocation2 + $0x18] sm:$0xff] %vm835_vm1, %v4716_v51  ;;  %v4714_v3 = vadd.f32 %v4702_v11, %v6680_v28 }
 0xbfa   : > { %4718 = vst.msk [vmem:[#allocation2 + $0x8] sm:$0xff] %vm835_vm1, %v4714_v3 }
 0xbfb   : > { %4725 = vst.msk [vmem:[%s6833_s30] sm:$0xff] %vm835_vm1, %v4713_v61  ;;  %4726 = vst.msk [vmem:[%s6833_s30 + $0x8] sm:$0xff] %vm835_vm1, %v4714_v3 }
 0xbfc   : > { %4727 = vst.msk [vmem:[%s6833_s30 + $0x10] sm:$0xff] %vm835_vm1, %v4715_v10  ;;  %4728 = vst.msk [vmem:[%s6833_s30 + $0x18] sm:$0xff] %vm835_vm1, %v4716_v51 }
 0xbfd PF: > { %s6834_s21 = sld [smem:[#allocation4_spill]] }
 0xbfe   : > { %s6836_s22 = sld [smem:[#allocation5_spill]] }
 0xc03   : > { %s26_s23 = sadd.s32 1, %s6834_s21   ;;  %s6835_s21 = sld [smem:[#allocation3_spill]] }
 0xc04   : > { %p23_p7 = scmp.ge.s32.totalorder %s26_s23, 4  }
 0xc06   :  { %25 = sbr.rel (!%p23_p7) target bundleno = 7 (0x7), region = 158 }

</bundles_post_ra>
